<compile_context>
chip_gen: v7x
topology: tpu7x:2x2x1
jax: 0.10.0
libtpu: 0.0.40
codegen_flags: <defaults>
</compile_context>

<pallas_src>
import numpy as np
import jax
import jax.numpy as jnp
from jax import lax
from jax.experimental import pallas as pl
from jax.experimental.pallas import tpu as pltpu

EPS = 1e-5
NEG_SLOPE = 0.2
_VMEM_LIMIT = 48 * 1024 * 1024   # scoped-VMEM ceiling: < 64 MiB (v7x physical),
                                 # comfortably < 128 MiB (v5e/v6e physical).


def _round_up(v, m):
    return (v + m - 1) // m * m


def _conv_tile_bytes(t, W, Cp):
    """Estimated per-step VMEM footprint of pass 1 for a TH=t row tile."""
    Wp = W + 2
    b = 2 * t * Wp * Cp * 2        # main input block (bf16, double buffered)
    b += 2 * 2 * Wp * Cp * 2       # 2-row halo block (bf16, double buffered)
    b += 2 * 3 * 3 * Cp * Cp * 2   # packed weights (3, 3*Cp, Cp) bf16
    b += 2 * t * W * Cp * 2        # bf16 conv-output block (double buffered)
    b += t * W * Cp * 4            # f32 accumulator scratch
    b += t * W * 3 * Cp * 2        # in-kernel width-im2col temporary (bf16)
    return b


def _pick_row_tile(N, H, W, Cp, budget_bytes=20 << 20):
    """Largest even row tile TH dividing H that fits the VMEM budget.

    Prefers >= 4 total grid steps so both v7x TensorCores get >= 2 pipelined
    steps under the all-parallel grid.
    """
    best = None
    for t in (512, 256, 128, 64, 32, 16, 8, 4, 2):
        if H % t or t % 2:
            continue
        if _conv_tile_bytes(t, W, Cp) > budget_bytes:
            continue
        if N * (H // t) >= 4:
            return t
        if best is None:
            best = t
    assert best is not None, "H must have an even divisor"  # TODO(synk): odd H unsupported
    return best


def _pick_flat_tile(M2, Cw, budget_bytes=12 << 20):
    """Row tile for the streaming pass 2 (bf16 in, f32 out)."""
    best = None
    for t in (8192, 4096, 2048, 1024, 512, 256, 128, 64, 32, 16, 8):
        if M2 % t:
            continue
        if 2 * t * Cw * (2 + 2 + 4) > budget_bytes:
            continue
        if M2 // t >= 2:
            return t
        if best is None:
            best = t
    return best if best is not None else M2


def _make_conv_moments_kernel(TH, W, Cp):
    """Pass 1: implicit-im2col 3x3 conv (K = 3*Cp matmuls) + BN partial moments."""
    HW = TH * W

    def kernel(xm_ref, xh_ref, w_ref, y_ref, mom_ref, acc_ref):
        # Width-direction im2col: the ONLY in-kernel relayout (3x slab volume,
        # bf16).  lhs[r*W + c, dx*Cp + ci] = x_padded[r, c + dx, ci].
        lhs_main = jnp.concatenate(
            [xm_ref[0, :, dx:dx + W, :] for dx in range(3)], axis=-1
        ).reshape(HW, 3 * Cp)                                 # (TH*W, 3*Cp)
        lhs_halo = jnp.concatenate(
            [xh_ref[0, :, dx:dx + W, :] for dx in range(3)], axis=-1
        ).reshape(2 * W, 3 * Cp)                              # (2*W,  3*Cp)

        # dy == 0: full-tile K=3*Cp matmul, direct store (no accumulator read).
        acc_ref[...] = jnp.dot(lhs_main, w_ref[0],
                               preferred_element_type=jnp.float32)
        # dy == 1, 2: upper output rows read the main block shifted down by dy
        # rows; the last dy output rows read the halo rows.  Row offsets are
        # multiples of W (W % 8 == 0 keeps the slices sublane-aligned views).
        for dy in (1, 2):
            top = (TH - dy) * W
            if top > 0:
                acc_ref[0:top, :] += jnp.dot(
                    lhs_main[dy * W:, :], w_ref[dy],
                    preferred_element_type=jnp.float32)
            acc_ref[top:HW, :] += jnp.dot(
                lhs_halo[0:dy * W, :], w_ref[dy],
                preferred_element_type=jnp.float32)

        acc = acc_ref[...]
        # bf16 conv intermediate (halves its HBM round trip); moments stay f32.
        y_ref[...] = acc.astype(jnp.bfloat16).reshape(1, TH, W, Cp)
        s1 = jnp.sum(acc, axis=0, keepdims=True)
        s2 = jnp.sum(acc * acc, axis=0, keepdims=True)
        mom_ref[...] = jnp.concatenate([s1, s2], axis=0).reshape(1, 1, 2, Cp)

    return kernel


def _bn_residual_lrelu_kernel(y_ref, x_ref, scale_ref, shift_ref, o_ref):
    """Pass 2: y*scale + shift (folded BN affine) + residual + LeakyReLU(0.2)."""
    z = (x_ref[...].astype(jnp.float32)
         + y_ref[...].astype(jnp.float32) * scale_ref[...]
         + shift_ref[...])
    o_ref[...] = jnp.where(z >= 0, z, NEG_SLOPE * z)


def resblock_pallas(x_nchw, w_oihw, gamma, beta):
    N, C, H, W = x_nchw.shape
    Cout = w_oihw.shape[0]
    assert Cout == C, "ResBlock requires input_dim == output_dim"
    assert H % 2 == 0, "even H required"   # halo-block indexing needs even TH

    # TODO(synk): for C << 128 the lane padding inflates HBM/MXU work by Cp/C;
    # a sub-128-channel path would need a non-matmul conv formulation.
    Cp = _round_up(C, 128)
    Wp = W + 2
    TH = _pick_row_tile(N, H, W, Cp)
    nH = H // TH

    # ---- wrapper glue: bf16 first so the transpose moves half the bytes ----
    x_nhwc = jnp.transpose(x_nchw.astype(jnp.bfloat16), (0, 2, 3, 1))        # (N,H,W,C)
    x_bf = jnp.pad(x_nhwc, ((0, 0), (0, 0), (0, 0), (0, Cp - C)))            # channel pad
    x_pad = jnp.pad(x_bf, ((0, 0), (1, 1), (1, 1), (0, 0)))                  # spatial pad

    # OIHW -> (dy, dx*Cp + cin, cout): one (3*Cp, Cp) RHS per kernel row so each
    # in-kernel matmul runs with K = 3*Cp (fills the 256-deep v6e/v7x MXU).
    w_p = jnp.pad(w_oihw.astype(jnp.float32),
                  ((0, Cp - C), (0, Cp - C), (0, 0), (0, 0)))
    w3 = jnp.transpose(w_p, (2, 3, 1, 0)).reshape(3, 3 * Cp, Cp).astype(jnp.bfloat16)

    # ---- pass 1: conv (implicit im2col, bf16 y) + per-tile BN moments ----
    conv_kernel = _make_conv_moments_kernel(TH, W, Cp)
    y, mom = pl.pallas_call(
        conv_kernel,
        out_shape=(jax.ShapeDtypeStruct((N, H, W, Cp), jnp.bfloat16),
                   jax.ShapeDtypeStruct((N, nH, 2, Cp), jnp.float32)),
        grid=(N, nH),
        in_specs=[
            # main TH-row block of the spatially padded input
            pl.BlockSpec((1, TH, Wp, Cp), lambda n, h: (n, h, 0, 0)),
            # 2 halo rows directly below the main block; TH is even so the
            # element offset (h+1)*TH is a multiple of this block's size 2.
            pl.BlockSpec((1, 2, Wp, Cp), lambda n, h: (n, (h + 1) * (TH // 2), 0, 0)),
            # the 3 K-fused weight slabs; constant block -> fetched once
            pl.BlockSpec((3, 3 * Cp, Cp), lambda n, h: (0, 0, 0)),
        ],
        out_specs=(
            pl.BlockSpec((1, TH, W, Cp), lambda n, h: (n, h, 0, 0)),
            pl.BlockSpec((1, 1, 2, Cp), lambda n, h: (n, h, 0, 0)),
        ),
        scratch_shapes=[pltpu.VMEM((TH * W, Cp), jnp.float32)],
        compiler_params=pltpu.CompilerParams(
            dimension_semantics=("parallel", "parallel"),
            vmem_limit_bytes=_VMEM_LIMIT),
    )(x_pad, x_pad, w3)

    # ---- tiny JAX reduction: global BN stats folded with gamma/beta ----
    Mf = float(N * H * W)
    sum_y = jnp.sum(mom[:, :, 0, :], axis=(0, 1))
    sum_y2 = jnp.sum(mom[:, :, 1, :], axis=(0, 1))
    mean = sum_y / Mf
    # TODO(synk): var = E[y^2]-mean^2 (single scan, f32); fine for near-zero-mean
    # conv outputs, loses precision only if |mean| >> std.
    var = jnp.maximum(sum_y2 / Mf - mean * mean, 0.0)
    gamma_p = jnp.pad(gamma.astype(jnp.float32), (0, Cp - C), constant_values=1.0)
    beta_p = jnp.pad(beta.astype(jnp.float32), (0, Cp - C))
    inv = lax.rsqrt(var + EPS)
    scale = gamma_p * inv
    shift = beta_p - mean * scale

    # ---- pass 2: normalize + residual + LeakyReLU on wide lane-dense tiles ----
    M = N * H * W
    g = 8 if M % 8 == 0 else 1        # (M, Cp) -> (M/8, 8*Cp): 1024-lane blocks
    M2, Cw = M // g, g * Cp
    TM = _pick_flat_tile(M2, Cw)
    scale_w = jnp.tile(scale.reshape(1, Cp), (1, g))
    shift_w = jnp.tile(shift.reshape(1, Cp), (1, g))

    out_flat = pl.pallas_call(
        _bn_residual_lrelu_kernel,
        out_shape=jax.ShapeDtypeStruct((M2, Cw), jnp.float32),
        grid=(M2 // TM,),
        in_specs=[
            pl.BlockSpec((TM, Cw), lambda i: (i, 0)),
            pl.BlockSpec((TM, Cw), lambda i: (i, 0)),
            pl.BlockSpec((1, Cw), lambda i: (0, 0)),
            pl.BlockSpec((1, Cw), lambda i: (0, 0)),
        ],
        out_specs=pl.BlockSpec((TM, Cw), lambda i: (i, 0)),
        compiler_params=pltpu.CompilerParams(
            dimension_semantics=("parallel",),
            vmem_limit_bytes=_VMEM_LIMIT),
    )(y.reshape(M2, Cw), x_bf.reshape(M2, Cw), scale_w, shift_w)

    out = out_flat.reshape(N, H, W, Cp)[..., :C]
    return jnp.transpose(out, (0, 3, 1, 2))


def resblock_reference(x_nchw, w_oihw, gamma, beta):
    """Pure-JAX f32 reference of the PyTorch forward (training-mode BN)."""
    y = lax.conv_general_dilated(
        x_nchw, w_oihw, window_strides=(1, 1), padding=((1, 1), (1, 1)),
        dimension_numbers=("NCHW", "OIHW", "NCHW"))
    mean = jnp.mean(y, axis=(0, 2, 3), keepdims=True)
    var = jnp.mean(jnp.square(y - mean), axis=(0, 2, 3), keepdims=True)
    y = (y - mean) * lax.rsqrt(var + EPS)
    y = y * gamma.reshape(1, -1, 1, 1) + beta.reshape(1, -1, 1, 1)
    z = x_nchw + y
    return jnp.where(z >= 0, z, NEG_SLOPE * z)


if __name__ == "__main__":
    N, C, H, W = 2, 4, 16, 16
    key = jax.random.PRNGKey(0)
    kx, kw = jax.random.split(key)

    x = jax.random.normal(kx, (N, C, H, W), dtype=jnp.float32)
    # Conv2d weight, gaussian init (mean 0, std 0.02), no bias.
    w = 0.02 * jax.random.normal(kw, (C, C, 3, 3), dtype=jnp.float32)
    # BatchNorm2d affine params at their defaults.
    gamma = jnp.ones((C,), dtype=jnp.float32)
    beta = jnp.zeros((C,), dtype=jnp.float32)

    out = jax.block_until_ready(resblock_pallas(x, w, gamma, beta))
    ref = jax.block_until_ready(resblock_reference(x, w, gamma, beta))

    assert out.shape == (N, C, H, W)
    # bf16 conv inputs / bf16 y / bf16 residual (f32 accumulation and BN math)
    # -> compare at bf16-level tolerance against the f32 reference.
    err = np.max(np.abs(np.asarray(out) - np.asarray(ref)))
    assert np.allclose(np.asarray(out), np.asarray(ref), atol=3e-2, rtol=3e-2), err

    print("KERNEL_OK")
</pallas_src>

<mosaic_0001>
module attributes {stable_mosaic.version = 11 : i64} {
  func.func @kernel(%arg0: i32, %arg1: i32, %arg2: memref<1x8x18x128xbf16, #tpu.memory_space<vmem>>, %arg3: memref<1x2x18x128xbf16, #tpu.memory_space<vmem>>, %arg4: memref<3x384x128xbf16, #tpu.memory_space<vmem>>, %arg5: memref<1x8x16x128xbf16, #tpu.memory_space<vmem>>, %arg6: memref<1x1x2x128xf32, #tpu.memory_space<vmem>>, %arg7: memref<128x128xf32, #tpu.memory_space<vmem>>) attributes {dimension_semantics = [#tpu.dimension_semantics<parallel>, #tpu.dimension_semantics<parallel>], iteration_bounds = array<i64: 2, 2>, scalar_prefetch = 0 : i64, scratch_operands = 1 : i64, tpu.core_type = #tpu.core_type<tc>, window_params = [{transform_indices = @transform_0, window_bounds = array<i64: 1, 8, 18, 128>}, {transform_indices = @transform_1, window_bounds = array<i64: 1, 2, 18, 128>}, {pipeline_mode = #tpu.pipeline_mode<synchronous>, transform_indices = @transform_2, window_bounds = array<i64: 3, 384, 128>}, {transform_indices = @transform_3, window_bounds = array<i64: 1, 8, 16, 128>}, {transform_indices = @transform_4, window_bounds = array<i64: 1, 1, 2, 128>}]} {
    %c0 = arith.constant 0 : index
    %c0_0 = arith.constant 0 : index
    %c0_1 = arith.constant 0 : index
    %c0_2 = arith.constant 0 : index
    %0 = vector.load %arg2[%c0, %c0_0, %c0_1, %c0_2] : memref<1x8x18x128xbf16, #tpu.memory_space<vmem>>, vector<1x8x16x128xbf16>
    %1 = vector.shape_cast %0 : vector<1x8x16x128xbf16> to vector<8x16x128xbf16>
    %c0_3 = arith.constant 0 : index
    %c0_4 = arith.constant 0 : index
    %c1 = arith.constant 1 : index
    %c0_5 = arith.constant 0 : index
    %2 = vector.load %arg2[%c0_3, %c0_4, %c1, %c0_5] : memref<1x8x18x128xbf16, #tpu.memory_space<vmem>>, vector<1x8x16x128xbf16>
    %3 = vector.shape_cast %2 : vector<1x8x16x128xbf16> to vector<8x16x128xbf16>
    %c0_6 = arith.constant 0 : index
    %c0_7 = arith.constant 0 : index
    %c2 = arith.constant 2 : index
    %c0_8 = arith.constant 0 : index
    %4 = vector.load %arg2[%c0_6, %c0_7, %c2, %c0_8] : memref<1x8x18x128xbf16, #tpu.memory_space<vmem>>, vector<1x8x16x128xbf16>
    %5 = vector.shape_cast %4 : vector<1x8x16x128xbf16> to vector<8x16x128xbf16>
    %6 = tpu.concatenate %1, %3, %5 in 2 : vector<8x16x128xbf16>, vector<8x16x128xbf16>, vector<8x16x128xbf16> -> vector<8x16x384xbf16>
    %7 = vector.shape_cast %6 : vector<8x16x384xbf16> to vector<128x384xbf16>
    %c0_9 = arith.constant 0 : index
    %c0_10 = arith.constant 0 : index
    %c0_11 = arith.constant 0 : index
    %c0_12 = arith.constant 0 : index
    %8 = vector.load %arg3[%c0_9, %c0_10, %c0_11, %c0_12] : memref<1x2x18x128xbf16, #tpu.memory_space<vmem>>, vector<1x2x16x128xbf16>
    %9 = vector.shape_cast %8 : vector<1x2x16x128xbf16> to vector<2x16x128xbf16>
    %c0_13 = arith.constant 0 : index
    %c0_14 = arith.constant 0 : index
    %c1_15 = arith.constant 1 : index
    %c0_16 = arith.constant 0 : index
    %10 = vector.load %arg3[%c0_13, %c0_14, %c1_15, %c0_16] : memref<1x2x18x128xbf16, #tpu.memory_space<vmem>>, vector<1x2x16x128xbf16>
    %11 = vector.shape_cast %10 : vector<1x2x16x128xbf16> to vector<2x16x128xbf16>
    %c0_17 = arith.constant 0 : index
    %c0_18 = arith.constant 0 : index
    %c2_19 = arith.constant 2 : index
    %c0_20 = arith.constant 0 : index
    %12 = vector.load %arg3[%c0_17, %c0_18, %c2_19, %c0_20] : memref<1x2x18x128xbf16, #tpu.memory_space<vmem>>, vector<1x2x16x128xbf16>
    %13 = vector.shape_cast %12 : vector<1x2x16x128xbf16> to vector<2x16x128xbf16>
    %14 = tpu.concatenate %9, %11, %13 in 2 : vector<2x16x128xbf16>, vector<2x16x128xbf16>, vector<2x16x128xbf16> -> vector<2x16x384xbf16>
    %15 = vector.shape_cast %14 : vector<2x16x384xbf16> to vector<32x384xbf16>
    %c0_21 = arith.constant 0 : index
    %c0_22 = arith.constant 0 : index
    %c0_23 = arith.constant 0 : index
    %16 = vector.load %arg4[%c0_21, %c0_22, %c0_23] : memref<3x384x128xbf16, #tpu.memory_space<vmem>>, vector<1x384x128xbf16>
    %17 = vector.shape_cast %16 : vector<1x384x128xbf16> to vector<384x128xbf16>
    %cst = arith.constant dense<0.000000e+00> : vector<128x128xf32>
    %18 = tpu.matmul %7, %17, %cst {dimension_numbers = #tpu.dot_dimension_numbers<[1], [0], [0], [1], [0, 0, 1, 1], [], []>} : vector<128x384xbf16>, vector<384x128xbf16>, vector<128x128xf32> -> vector<128x128xf32>
    %c0_24 = arith.constant 0 : index
    %c0_25 = arith.constant 0 : index
    %19 = vector.load %arg7[%c0_24, %c0_25] : memref<128x128xf32, #tpu.memory_space<vmem>>, vector<128x128xf32>
    tpu.vector_store %arg7[%c0_24, %c0_25], %18 {strides = array<i32>} : memref<128x128xf32, #tpu.memory_space<vmem>>, vector<128x128xf32>,
    %c0_26 = arith.constant 0 : index
    %c0_27 = arith.constant 0 : index
    %20 = vector.load %arg7[%c0_26, %c0_27] : memref<128x128xf32, #tpu.memory_space<vmem>>, vector<112x128xf32>
    %21 = vector.extract_strided_slice %7 {offsets = [16, 0], sizes = [112, 384], strides = [1, 1]} : vector<128x384xbf16> to vector<112x384xbf16>
    %c1_28 = arith.constant 1 : index
    %c0_29 = arith.constant 0 : index
    %c0_30 = arith.constant 0 : index
    %22 = vector.load %arg4[%c1_28, %c0_29, %c0_30] : memref<3x384x128xbf16, #tpu.memory_space<vmem>>, vector<1x384x128xbf16>
    %23 = vector.shape_cast %22 : vector<1x384x128xbf16> to vector<384x128xbf16>
    %cst_31 = arith.constant dense<0.000000e+00> : vector<112x128xf32>
    %24 = tpu.matmul %21, %23, %cst_31 {dimension_numbers = #tpu.dot_dimension_numbers<[1], [0], [0], [1], [0, 0, 1, 1], [], []>} : vector<112x384xbf16>, vector<384x128xbf16>, vector<112x128xf32> -> vector<112x128xf32>
    %25 = arith.addf %20, %24 : vector<112x128xf32>
    %c0_32 = arith.constant 0 : index
    %c0_33 = arith.constant 0 : index
    %26 = vector.load %arg7[%c0_32, %c0_33] : memref<128x128xf32, #tpu.memory_space<vmem>>, vector<112x128xf32>
    tpu.vector_store %arg7[%c0_32, %c0_33], %25 {strides = array<i32>} : memref<128x128xf32, #tpu.memory_space<vmem>>, vector<112x128xf32>,
    %c112 = arith.constant 112 : index
    %c0_34 = arith.constant 0 : index
    %27 = vector.load %arg7[%c112, %c0_34] : memref<128x128xf32, #tpu.memory_space<vmem>>, vector<16x128xf32>
    %28 = vector.extract_strided_slice %15 {offsets = [0, 0], sizes = [16, 384], strides = [1, 1]} : vector<32x384xbf16> to vector<16x384xbf16>
    %c1_35 = arith.constant 1 : index
    %c0_36 = arith.constant 0 : index
    %c0_37 = arith.constant 0 : index
    %29 = vector.load %arg4[%c1_35, %c0_36, %c0_37] : memref<3x384x128xbf16, #tpu.memory_space<vmem>>, vector<1x384x128xbf16>
    %30 = vector.shape_cast %29 : vector<1x384x128xbf16> to vector<384x128xbf16>
    %cst_38 = arith.constant dense<0.000000e+00> : vector<16x128xf32>
    %31 = tpu.matmul %28, %30, %cst_38 {dimension_numbers = #tpu.dot_dimension_numbers<[1], [0], [0], [1], [0, 0, 1, 1], [], []>} : vector<16x384xbf16>, vector<384x128xbf16>, vector<16x128xf32> -> vector<16x128xf32>
    %32 = arith.addf %27, %31 : vector<16x128xf32>
    %c112_39 = arith.constant 112 : index
    %c0_40 = arith.constant 0 : index
    %33 = vector.load %arg7[%c112_39, %c0_40] : memref<128x128xf32, #tpu.memory_space<vmem>>, vector<16x128xf32>
    tpu.vector_store %arg7[%c112_39, %c0_40], %32 {strides = array<i32>} : memref<128x128xf32, #tpu.memory_space<vmem>>, vector<16x128xf32>,
    %c0_41 = arith.constant 0 : index
    %c0_42 = arith.constant 0 : index
    %34 = vector.load %arg7[%c0_41, %c0_42] : memref<128x128xf32, #tpu.memory_space<vmem>>, vector<96x128xf32>
    %35 = vector.extract_strided_slice %7 {offsets = [32, 0], sizes = [96, 384], strides = [1, 1]} : vector<128x384xbf16> to vector<96x384xbf16>
    %c2_43 = arith.constant 2 : index
    %c0_44 = arith.constant 0 : index
    %c0_45 = arith.constant 0 : index
    %36 = vector.load %arg4[%c2_43, %c0_44, %c0_45] : memref<3x384x128xbf16, #tpu.memory_space<vmem>>, vector<1x384x128xbf16>
    %37 = vector.shape_cast %36 : vector<1x384x128xbf16> to vector<384x128xbf16>
    %cst_46 = arith.constant dense<0.000000e+00> : vector<96x128xf32>
    %38 = tpu.matmul %35, %37, %cst_46 {dimension_numbers = #tpu.dot_dimension_numbers<[1], [0], [0], [1], [0, 0, 1, 1], [], []>} : vector<96x384xbf16>, vector<384x128xbf16>, vector<96x128xf32> -> vector<96x128xf32>
    %39 = arith.addf %34, %38 : vector<96x128xf32>
    %c0_47 = arith.constant 0 : index
    %c0_48 = arith.constant 0 : index
    %40 = vector.load %arg7[%c0_47, %c0_48] : memref<128x128xf32, #tpu.memory_space<vmem>>, vector<96x128xf32>
    tpu.vector_store %arg7[%c0_47, %c0_48], %39 {strides = array<i32>} : memref<128x128xf32, #tpu.memory_space<vmem>>, vector<96x128xf32>,
    %c96 = arith.constant 96 : index
    %c0_49 = arith.constant 0 : index
    %41 = vector.load %arg7[%c96, %c0_49] : memref<128x128xf32, #tpu.memory_space<vmem>>, vector<32x128xf32>
    %c2_50 = arith.constant 2 : index
    %c0_51 = arith.constant 0 : index
    %c0_52 = arith.constant 0 : index
    %42 = vector.load %arg4[%c2_50, %c0_51, %c0_52] : memref<3x384x128xbf16, #tpu.memory_space<vmem>>, vector<1x384x128xbf16>
    %43 = vector.shape_cast %42 : vector<1x384x128xbf16> to vector<384x128xbf16>
    %cst_53 = arith.constant dense<0.000000e+00> : vector<32x128xf32>
    %44 = tpu.matmul %15, %43, %cst_53 {dimension_numbers = #tpu.dot_dimension_numbers<[1], [0], [0], [1], [0, 0, 1, 1], [], []>} : vector<32x384xbf16>, vector<384x128xbf16>, vector<32x128xf32> -> vector<32x128xf32>
    %45 = arith.addf %41, %44 : vector<32x128xf32>
    %c96_54 = arith.constant 96 : index
    %c0_55 = arith.constant 0 : index
    %46 = vector.load %arg7[%c96_54, %c0_55] : memref<128x128xf32, #tpu.memory_space<vmem>>, vector<32x128xf32>
    tpu.vector_store %arg7[%c96_54, %c0_55], %45 {strides = array<i32>} : memref<128x128xf32, #tpu.memory_space<vmem>>, vector<32x128xf32>,
    %c0_56 = arith.constant 0 : index
    %c0_57 = arith.constant 0 : index
    %47 = vector.load %arg7[%c0_56, %c0_57] : memref<128x128xf32, #tpu.memory_space<vmem>>, vector<128x128xf32>
    %48 = arith.truncf %47 : vector<128x128xf32> to vector<128x128xbf16>
    %49 = vector.shape_cast %48 : vector<128x128xbf16> to vector<1x8x16x128xbf16>
    %c0_58 = arith.constant 0 : index
    %c0_59 = arith.constant 0 : index
    %c0_60 = arith.constant 0 : index
    %c0_61 = arith.constant 0 : index
    %50 = vector.load %arg5[%c0_58, %c0_59, %c0_60, %c0_61] : memref<1x8x16x128xbf16, #tpu.memory_space<vmem>>, vector<1x8x16x128xbf16>
    tpu.vector_store %arg5[%c0_58, %c0_59, %c0_60, %c0_61], %49 {strides = array<i32>} : memref<1x8x16x128xbf16, #tpu.memory_space<vmem>>, vector<1x8x16x128xbf16>,
    %cst_62 = arith.constant dense<0.000000e+00> : vector<128xf32>
    %51 = vector.multi_reduction <add>, %47, %cst_62 [0] : vector<128x128xf32> to vector<128xf32>
    %52 = vector.shape_cast %51 : vector<128xf32> to vector<1x128xf32>
    %53 = arith.mulf %47, %47 : vector<128x128xf32>
    %cst_63 = arith.constant dense<0.000000e+00> : vector<128xf32>
    %54 = vector.multi_reduction <add>, %53, %cst_63 [0] : vector<128x128xf32> to vector<128xf32>
    %55 = vector.shape_cast %54 : vector<128xf32> to vector<1x128xf32>
    %56 = tpu.concatenate %52, %55 in 0 : vector<1x128xf32>, vector<1x128xf32> -> vector<2x128xf32>
    %57 = vector.shape_cast %56 : vector<2x128xf32> to vector<1x1x2x128xf32>
    %c0_64 = arith.constant 0 : index
    %c0_65 = arith.constant 0 : index
    %c0_66 = arith.constant 0 : index
    %c0_67 = arith.constant 0 : index
    %58 = vector.load %arg6[%c0_64, %c0_65, %c0_66, %c0_67] : memref<1x1x2x128xf32, #tpu.memory_space<vmem>>, vector<1x1x2x128xf32>
    tpu.vector_store %arg6[%c0_64, %c0_65, %c0_66, %c0_67], %57 {strides = array<i32>} : memref<1x1x2x128xf32, #tpu.memory_space<vmem>>, vector<1x1x2x128xf32>,
    return
  }
  func.func @transform_0(%arg0: i32, %arg1: i32) -> (i32, i32, i32, i32) {
    %c0_i32 = arith.constant 0 : i32
    %c0_i32_0 = arith.constant 0 : i32
    %c0_i32_1 = arith.constant 0 : i32
    return %arg0, %arg1, %c0_i32, %c0_i32_0 : i32, i32, i32, i32
  }
  func.func @transform_1(%arg0: i32, %arg1: i32) -> (i32, i32, i32, i32) {
    %c1_i32 = arith.constant 1 : i32
    %0 = arith.addi %arg1, %c1_i32 : i32
    %c4_i32 = arith.constant 4 : i32
    %1 = arith.muli %0, %c4_i32 : i32
    %c0_i32 = arith.constant 0 : i32
    %c0_i32_0 = arith.constant 0 : i32
    %c0_i32_1 = arith.constant 0 : i32
    return %arg0, %1, %c0_i32, %c0_i32_0 : i32, i32, i32, i32
  }
  func.func @transform_2(%arg0: i32, %arg1: i32) -> (i32, i32, i32) {
    %c0_i32 = arith.constant 0 : i32
    %c0_i32_0 = arith.constant 0 : i32
    %c0_i32_1 = arith.constant 0 : i32
    %c0_i32_2 = arith.constant 0 : i32
    return %c0_i32, %c0_i32_0, %c0_i32_1 : i32, i32, i32
  }
  func.func @transform_3(%arg0: i32, %arg1: i32) -> (i32, i32, i32, i32) {
    %c0_i32 = arith.constant 0 : i32
    %c0_i32_0 = arith.constant 0 : i32
    %c0_i32_1 = arith.constant 0 : i32
    return %arg0, %arg1, %c0_i32, %c0_i32_0 : i32, i32, i32, i32
  }
  func.func @transform_4(%arg0: i32, %arg1: i32) -> (i32, i32, i32, i32) {
    %c0_i32 = arith.constant 0 : i32
    %c0_i32_0 = arith.constant 0 : i32
    %c0_i32_1 = arith.constant 0 : i32
    return %arg0, %arg1, %c0_i32, %c0_i32_0 : i32, i32, i32, i32
  }
}

</mosaic_0001>

<bundles_post_ra>
// kernel: tpu_custom_call.1
= control target key start
LH: loop header
LB: loop body
LE: loop exit
PB: predicated region body
PF: predicated region fallthrough
CT: control target
= control target key end

     0   :  { %10 = vsyncpa [#allocation4], 0  ;;  %s4974_s0 = inlined_call_operand.vmem [shape: bf16[2,18,18,128], index: 0, kind: input, shape index: {}]   ;;  %s4975_s1 = inlined_call_operand.vmem [shape: bf16[2,18,18,128], index: 1, kind: input, shape index: {}]   ;;  %s4976_s2 = inlined_call_operand.vmem [shape: bf16[3,384,128], index: 2, kind: input, shape index: {}]   ;;  %s4977_s3 = inlined_call_operand.hbm [shape: bf16[2,16,16,128], index: 3, kind: output, shape index: {0}]   ;;  %s4978_s4 = inlined_call_operand.hbm [shape: f32[2,2,2,128], index: 4, kind: output, shape index: {1}]  }
   0x1   :  { %12 = vsyncpa [#allocation4 + $0x1], 0 }
   0x2   :  { %13 = vsyncpa [#allocation6], 0 }
   0x3   :  { %15 = vsyncpa [#allocation6 + $0x1], 0  ;;  %s4055_s15 = smov 0   ;;  %s4057_s16 = smov 0  }
   0x4   :  { %s4059_s17 = smov 0   ;;  %s4061_s18 = smov 0  }
   0x5   :  { %s4063_s19 = smov 0   ;;  %s4065_s20 = smov 0  }
   0x6   :  { %s4067_s21 = smov 0   ;;  %s4069_s22 = smov 0  }
   0x7 LB: > { %s2776_s23 = sadd.s32 4294967295, %s4022_s22   ;;  %s2777_s24 = sadd.s32 4294967294, %s4022_s22   ;;  %s4022_s22 = sphi %s4069_s22, %s21_s22   ;;  %s4018_s21 = sphi %s4067_s21, %s4993_s21   ;;  %s4014_s20 = sphi %s4065_s20, %s4992_s20   ;;  %s4010_s19 = sphi %s4063_s19, %s4991_s19   ;;  %s4006_s18 = sphi %s4061_s18, %s4990_s18   ;;  %s4002_s17 = sphi %s4059_s17, %s4989_s17   ;;  %s3998_s16 = sphi %s4057_s16, %s4988_s16   ;;  %s3994_s15 = sphi %s4055_s15, %s4987_s15  }
   0x8   : > { %s30_s25 = sadd.s32 1, %s4014_s20  ;;  %s33_s26 = sadd.s32 1, %s4018_s21 }
   0x9   : > { %p31_p0 = scmp.ge.s32.totalorder %s30_s25, 2  ;;  %p133_p1 = scmp.ne.s32.totalorder %s4002_s17, %s3998_s16 }
   0xa   : > { %p134_p2 = scmp.eq.s32.totalorder %s2776_s23, 3  ;;  %p139_p5 = scmp.ne.s32.totalorder %s3998_s16, %s3994_s15 }
   0xb   : > { %s4995_s25 = smov (%p31_p0, %s30_s25), 0  ;;  %s4997_s26 = smov (!%p31_p0, %s33_s26), %s4018_s21 }
   0xc   : > { %s119_s27 = ssub.s32 %s4014_s20, %s4995_s25  ;;  %p4106_p3 = por %p134_p2, %p133_p1 }
   0xd   : > { %p35_p4 = scmp.ge.s32.totalorder %s4997_s26, 2  ;;  %p140_p6 = scmp.eq.s32.totalorder %s2777_s24, 3 }
   0xe   : > { %p2782_p7 = scmp.ge.s32.totalorder %s4022_s22, 1  ;;  %p231_p9 = scmp.lt.s32.totalorder %s4022_s22, 5 }
   0xf   : > { %s4999_s26 = smov (%p35_p4, %s4997_s26), 0  ;;  %p4115_p8 = por %p140_p6, %p139_p5 }
  0x10   : > { %4982 = sst [smem:[#allocation9_spill]] %s4999_s26  ;;  %s118_s30 = ssub.s32 %s4018_s21, %s4999_s26 }
  0x11   : > { %s123_s5 = sadd.s32 1, %s4002_s17  ;;  %s120_s6 = sor.u32 %s119_s27, %s118_s30 }
  0x12   : > { %p232_p10 = pnand %p2782_p7, %p231_p9  ;;  %p121_p11 = scmp.eq.s32.totalorder %s120_s6, 0 }
  0x13   : > { %v3746_v0 = vld [vmem:[%s4976_s2 + $0x40] sm:$0xff] (!%p232_p10)   ;;  %s4130_s10 = sshll.u32 (!%p232_p10), %s4006_s18, 3  ;;  %p290_p12 = scmp.lt.s32.totalorder (!%p232_p10), %s4010_s19, 1  ;;  %v3749_v3 = vld [vmem:[%s4976_s2 + $0x48] sm:$0xff] (!%p232_p10)   ;;  %v3752_v6 = vld [vmem:[%s4976_s2 + $0x50] sm:$0xff] (!%p232_p10)   ;;  %vm555_vm1 = vcmask (!%p232_p10), 1046528  }
  0x14   : > { %s4124_s7 = scalar_select %p121_p11, %s4002_s17, %s123_s5  }
  0x15   : > { %235 = sbr.rel (%p232_p10) target bundleno = 502 (0x1f6), region = 32  ;;  %v3747_v1 = vld [vmem:[%s4976_s2] sm:$0xff] (!%p232_p10)   ;;  %3231 = vmatprep.subr.bf16.mxu0 (!%p232_p10), %v3746_v0  ;;  %p292_p13 = scmp.lt.s32.totalorder (!%p232_p10), %s4130_s10, 17  ;;  %v3750_v4 = vld [vmem:[%s4976_s2 + $0x8] sm:$0xff] (!%p232_p10)   ;;  %v3753_v7 = vld [vmem:[%s4976_s2 + $0x10] sm:$0xff] (!%p232_p10)   ;;  %v4024_v47 = vmov (!%p232_p10), 0.0  }
  0x16   : > { %v3748_v2 = vld [vmem:[%s4976_s2 + $0x80] sm:$0xff] (!%p232_p10)   ;;  %3232 = vmatpush3.bf16.msra.mxu0 (!%p232_p10), %v3747_v1  ;;  %v3751_v5 = vld [vmem:[%s4976_s2 + $0x88] sm:$0xff] (!%p232_p10)   ;;  %v3754_v8 = vld [vmem:[%s4976_s2 + $0x90] sm:$0xff] (!%p232_p10)   ;;  %vm426_vm0 = vsmask.f32 (!%p232_p10), 7424  ;;  %vm4025_vm2 = vmmov (!%p232_p10), 0  }
  0x17   : > { %3519 = vmatprep.subr.bf16.mxu1 (!%p232_p10), %v3748_v2  ;;  %3233 = vmatprep.subr.bf16.mxu0 (!%p232_p10), %v3749_v3  ;;  %v3755_v9 = vld [vmem:[%s4976_s2 + $0x58] sm:$0xff] (!%p232_p10)   ;;  %v3758_v12 = vld [vmem:[%s4976_s2 + $0x60] sm:$0xff] (!%p232_p10)   ;;  %v3761_v15 = vld [vmem:[%s4976_s2 + $0x68] sm:$0xff] (!%p232_p10)  }
  0x18   : > { %3520 = vmatpush3.bf16.msra.mxu1 (!%p232_p10), %v3748_v2  ;;  %v3756_v10 = vld [vmem:[%s4976_s2 + $0x18] sm:$0xff] (!%p232_p10)   ;;  %v3760_v13 = vld [vmem:[%s4976_s2 + $0xa0] sm:$0xff] (!%p232_p10)   ;;  %v3763_v16 = vld [vmem:[%s4976_s2 + $0xa8] sm:$0xff] (!%p232_p10)  }
  0x19   : > { %3521 = vmatprep.subr.bf16.mxu1 (!%p232_p10), %v3751_v5  ;;  %v3757_v11 = vld [vmem:[%s4976_s2 + $0x98] sm:$0xff] (!%p232_p10)   ;;  %v3759_v14 = vld [vmem:[%s4976_s2 + $0x20] sm:$0xff] (!%p232_p10)   ;;  %v3762_v17 = vld [vmem:[%s4976_s2 + $0x28] sm:$0xff] (!%p232_p10)  }
  0x1a   : > { %3234 = vmatpush3.bf16.msra.mxu0 (!%p232_p10), %v3750_v4  ;;  %v3764_v18 = vld [vmem:[%s4976_s2 + $0x70] sm:$0xff] (!%p232_p10)   ;;  %v3767_v21 = vld [vmem:[%s4976_s2 + $0x78] sm:$0xff] (!%p232_p10)   ;;  %v3773_v41 = vld [vmem:[%s4976_s2 + $0x140] sm:$0xff] (!%p232_p10)  }
  0x1b   : > { %3235 = vmatprep.subr.bf16.mxu0 (!%p232_p10), %v3752_v6  ;;  %v3765_v19 = vld [vmem:[%s4976_s2 + $0x30] sm:$0xff] (!%p232_p10)   ;;  %v3769_v24 = vld [vmem:[%s4976_s2 + $0xb8] sm:$0xff] (!%p232_p10)   ;;  %v3777_v44 = vld [vmem:[%s4976_s2 + $0x100] sm:$0xff] (!%p232_p10)  }
  0x1c   : > { %s4153_s11 = scalar_select %p290_p12, %s4010_s19, 1  ;;  %3522 = vmatpush3.bf16.msra.mxu1 %v3751_v5  ;;  %v3766_v20 = vld [vmem:[%s4976_s2 + $0xb0] sm:$0xff]   ;;  %v3768_v28 = vld [vmem:[%s4976_s2 + $0x38] sm:$0xff]   ;;  %v3778_v53 = vld [vmem:[%s4976_s2 + $0xc0] sm:$0xff]  }
  0x1d   : > { %s293_s14 = scalar_select %p292_p13, %s4130_s10, 17  ;;  %3523 = vmatprep.subr.bf16.mxu1 %v3754_v8  ;;  %v3779_v57 = vld [vmem:[%s4976_s2 + $0x108] sm:$0xff]   ;;  %v3788_v3 = vld [vmem:[%s4976_s2 + $0x110] sm:$0xff]  }
  0x1e   : > { %s4980_s8 = smul.u32 54, %s4153_s11  ;;  %3236 = vmatpush3.bf16.msra.mxu0 %v3753_v7  ;;  %v3780_v59 = vld [vmem:[%s4976_s2 + $0x148] sm:$0xff]  }
  0x1f   : > { %s3663_s13 = smul.u32 3, %s293_s14  ;;  %3237 = vmatprep.subr.bf16.mxu0 %v3755_v9  ;;  %v3781_v0 = vld [vmem:[%s4976_s2 + $0xc8] sm:$0xff]  }
  0x20   : > { %3524 = vmatpush3.bf16.msra.mxu1 %v3754_v8 }
  0x21   : > { %3525 = vmatprep.subr.bf16.mxu1 %v3757_v11  ;;  %s296_s9 = sadd.s32 %s4980_s8, %s3663_s13  ;;  %s3223_s13 = sadd.s32 8, %s4130_s10 }
  0x22   : > { %3238 = vmatpush3.bf16.msra.mxu0 %v3756_v10  ;;  %s2786_s27 = sshll.u32 %s296_s9, 2  ;;  %p4399_p0 = scmp.lt.s32.totalorder %s3223_s13, 17 }
  0x23   : > { %3239 = vmatprep.subr.bf16.mxu0 %v3758_v12  ;;  %s4201_s23 = scalar_lea.vmem %s4974_s0, %s2786_s27  ;;  %v3789_v12 = vld [vmem:[%s4976_s2 + $0xd0] sm:$0xff]  }
  0x24   : > { %3526 = vmatpush3.bf16.msra.mxu1 %v3757_v11  ;;  %v322_v22 = vld [vmem:[%s4201_s23] sm:$0xf]  ;;  %v323_v23 = vld [vmem:[%s4201_s23 + $0x4] sm:$0xf]  ;;  %v324_v33 = vld [vmem:[%s4201_s23 + $0xc] sm:$0xf] }
  0x25   : > { %3527 = vmatprep.subr.bf16.mxu1 %v3760_v13  ;;  %v2790_v25 = vcombine.low %v322_v22, %v323_v23  ;;  %v3771_v26 = vld [vmem:[%s4201_s23 + $0x8] ss:$0 sps:$4 sm:$0x11]   ;;  %v346_v27 = vld [vmem:[%s4201_s23] sm:$0xe]  ;;  %s5001_s13 = smov (!%p4399_p0, %s3223_s13), 17 }
  0x26   : > { %3240 = vmatpush3.bf16.msra.mxu0 %v3759_v14  ;;  %v435_v31 = vshll.u32 %v3771_v26, 16  ;;  %v2806_v32 = vcombine.low %v346_v27, %v323_v23  ;;  %v557_v34 = vrot.slane %v3771_v26, 1  ;;  %v325_v35 = vld [vmem:[%s4201_s23 + $0x10] sm:$0xf]  ;;  %v347_v39 = vld [vmem:[%s4201_s23 + $0xc] sm:$0xe] }
  0x27   : > { %3241 = vmatprep.subr.bf16.mxu0 %v3761_v15  ;;  %v428_v29 = vshrl.u32 %v2790_v25, 16  ;;  %v430_v30 = vshll.u32 %v2790_v25, 16  ;;  %v4222_v40 = vcombine.low %v324_v33, %v325_v35  ;;  %v3775_v42 = vld [vmem:[%s4201_s23 + $0x14] ss:$0 sps:$4 sm:$0x11]   ;;  %v2807_v43 = vcombine.low %v347_v39, %v325_v35  ;;  %v3800_v39 = vld [vmem:[%s4976_s2 + $0xe0] sm:$0xff]  }
  0x28   : > { %3528 = vmatpush3.bf16.msra.mxu1 %v3760_v13  ;;  %v437_v37 = vrot.slane %v435_v31, 1  ;;  %v556_v38 = vrot.slane %v2806_v32, 1  ;;  %v560_v49 = vrot.slane %v3775_v42, 1  ;;  %v447_v54 = vshll.u32 %v3775_v42, 16  ;;  %v326_v60 = vld [vmem:[%s4201_s23 + $0x18] sm:$0xf] }
  0x29   : > { %3529 = vmatprep.subr.bf16.mxu1 %v3763_v16  ;;  %v432_v36 = vrot.slane %v430_v30, 1  ;;  %v559_v48 = vrot.slane %v2807_v43, 1  ;;  %v440_v50 = vshrl.u32 %v4222_v40, 16  ;;  %v442_v51 = vshll.u32 %v4222_v40, 16  ;;  %v327_v62 = vld [vmem:[%s4201_s23 + $0x1c] sm:$0xf] }
  0x2a   : > { %3242 = vmatpush3.bf16.msra.mxu0 %v3762_v17  ;;  %v558_v46 = vsel %vm555_vm1, %v556_v38, %v557_v34  ;;  %v449_v58 = vrot.slane %v447_v54, 1  ;;  %v348_v63 = vld [vmem:[%s4201_s23 + $0x18] sm:$0xe]  ;;  %v3783_v1 = vld [vmem:[%s4201_s23 + $0x20] ss:$0 sps:$4 sm:$0x11]   ;;  %v4263_v5 = vcombine.low %v326_v60, %v327_v62 }
  0x2b   : > { %3243 = vmatprep.subr.bf16.mxu0 %v3764_v18  ;;  %v433_v45 = vor.u32 %v432_v36, %v428_v29  ;;  %3535 = vmatprep.mubr.bf16.mxu1 %v558_v46  ;;  %v4240_v55 = vsel %vm555_vm1, %v559_v48, %v560_v49  ;;  %v444_v56 = vrot.slane %v442_v51, 1  ;;  %v2808_v2 = vcombine.low %v348_v63, %v327_v62  ;;  %v329_v6 = vld [vmem:[%s4201_s23 + $0x28] sm:$0xf]  ;;  %v349_v7 = vld [vmem:[%s4201_s23 + $0x24] sm:$0xe]  ;;  %v3791_v13 = vld [vmem:[%s4976_s2 + $0x150] sm:$0xff]  }
  0x2c   : > { %3530 = vmatpush3.bf16.msra.mxu1 %v3763_v16  ;;  %v563_v9 = vrot.slane %v3783_v1, 1  ;;  %v3786_v10 = vld [vmem:[%s4201_s23 + $0x2c] ss:$0 sps:$4 sm:$0x11]   ;;  %v2809_v11 = vcombine.low %v349_v7, %v329_v6  ;;  %v328_v15 = vld [vmem:[%s4201_s23 + $0x24] sm:$0xf] }
  0x2d   : > { %3531 = vmatprep.subr.bf16.mxu1 %v3766_v20  ;;  %v438_v52 = vsel %vm426_vm0, %v433_v45, %v437_v37  ;;  %v445_v61 = vor.u32 %v444_v56, %v440_v50  ;;  %v562_v8 = vrot.slane %v2808_v2, 1  ;;  %v566_v17 = vrot.slane %v3786_v10, 1  ;;  %v331_v26 = vld [vmem:[%s4201_s23 + $0x34] sm:$0xf]  ;;  %v350_v27 = vld [vmem:[%s4201_s23 + $0x30] sm:$0xe] }
  0x2e   : > { %3244 = vmatpush3.bf16.msra.mxu0 %v3765_v19  ;;  %878 = vmatprep.mubr.bf16.mxu0 %v438_v52  ;;  %v565_v16 = vrot.slane %v2809_v11, 1  ;;  %v452_v18 = vshrl.u32 %v4263_v5, 16  ;;  %v3790_v19 = vld [vmem:[%s4976_s2 + $0x118] sm:$0xff]   ;;  %v2810_v31 = vcombine.low %v350_v27, %v331_v26  ;;  %v3799_v32 = vld [vmem:[%s4976_s2 + $0x120] sm:$0xff]   ;;  %v3801_v46 = vld [vmem:[%s4976_s2 + $0x128] sm:$0xff]   ;;  %v471_v50 = vshll.u32 %v3786_v10, 16 }
  0x2f   : > { %3245 = vmatprep.subr.bf16.mxu0 %v3767_v21  ;;  %v4261_v4 = vsel %vm426_vm0, %v445_v61, %v449_v58  ;;  %v4276_v14 = vsel %vm555_vm1, %v562_v8, %v563_v9  ;;  %v459_v21 = vshll.u32 %v3783_v1, 16  ;;  %v4300_v30 = vld [vmem:[%s4201_s23 + $0x38] ss:$0 sps:$4 sm:$0x11]   ;;  %v333_v33 = vld [vmem:[%s4201_s23 + $0x40] sm:$0xf] }
  0x30   : > { %3532 = vmatpush3.bf16.msra.mxu1 %v3766_v20  ;;  %v454_v20 = vshll.u32 %v4263_v5, 16  ;;  %v4288_v22 = vsel %vm555_vm1, %v565_v16, %v566_v17  ;;  %v351_v34 = vld [vmem:[%s4201_s23 + $0x3c] sm:$0xe]  ;;  %v568_v36 = vrot.slane %v2810_v31, 1  ;;  %v569_v37 = vrot.slane %v4300_v30, 1  ;;  %v3803_v56 = vld [vmem:[%s4976_s2 + $0xe8] sm:$0xff]  }
  0x31   : > { %3533 = vmatprep.subr.bf16.mxu1 %v3769_v24  ;;  %v4312_v38 = vld [vmem:[%s4201_s23 + $0x44] ss:$0 sps:$4 sm:$0x11]   ;;  %v330_v48 = vld [vmem:[%s4201_s23 + $0x30] sm:$0xf]  ;;  %v3802_v52 = vld [vmem:[%s4976_s2 + $0x158] sm:$0xff]  }
  0x32   : > { %3246 = vmatpush3.bf16.msra.mxu0 %v3768_v28  ;;  %v456_v23 = vrot.slane %v454_v20, 1  ;;  %v4297_v28 = vcombine.low %v328_v15, %v329_v6  ;;  %v4319_v42 = vsel %vm555_vm1, %v568_v36, %v569_v37  ;;  %v572_v43 = vrot.slane %v4312_v38, 1  ;;  %v335_v58 = vld [vmem:[%s4201_s23 + $0x4c] sm:$0xf]  ;;  %v3810_v61 = vld [vmem:[%s4976_s2 + $0x130] sm:$0xff]   ;;  %v3812_v20 = vld [vmem:[%s4976_s2 + $0x138] sm:$0xff]  }
  0x33   : > { %3551 = vmatprep.subr.bf16.mxu0 %v4024_v47  ;;  %v473_v54 = vrot.slane %v471_v50, 1  ;;  %v4344_v60 = vld [vmem:[%s4201_s23 + $0x50] ss:$0 sps:$4 sm:$0x11]   ;;  %v4349_v62 = vcombine.low %v330_v48, %v331_v26  ;;  %v332_v63 = vld [vmem:[%s4201_s23 + $0x3c] sm:$0xf] }
  0x34   : > { %3534 = vmatpush3.bf16.msra.mxu1 %v3769_v24  ;;  %v461_v24 = vrot.slane %v459_v21, 1  ;;  %v457_v29 = vor.u32 %v456_v23, %v452_v18  ;;  %v466_v45 = vshll.u32 %v4297_v28, 16  ;;  %v337_v2 = vld [vmem:[%s4201_s23 + $0x58] sm:$0xf]  ;;  %v575_v6 = vrot.slane %v4344_v60, 1  ;;  %v3811_v11 = vld [vmem:[%s4976_s2 + $0xf0] sm:$0xff]  }
  0x35   : > { %3311 = vmatprep.subr.bf16.mxu1 %v3777_v44  ;;  %879 = vmatmul.mubr.bf16.vlgmr.msra.gmra.mrb[0].mxu0 %v2790_v25  ;;  %v3792_v25 = vld [vmem:[%s4976_s2 + $0xd8] sm:$0xff]   ;;  %v464_v44 = vshrl.u32 %v4297_v28, 16  ;;  %v353_v7 = vld [vmem:[%s4201_s23 + $0x54] sm:$0xe]  ;;  %v476_v15 = vshrl.u32 %v4349_v62, 16  ;;  %v478_v18 = vshll.u32 %v4349_v62, 16 }
  0x36   : > { %3552 = vmatpush3.bf16.msra.mxu0 %v3773_v41  ;;  %886 = vmatprep.mubr.bf16.mxu0 %v4261_v4  ;;  %v4308_v35 = vsel %vm426_vm0, %v457_v29, %v461_v24  ;;  %v2811_v41 = vcombine.low %v351_v34, %v333_v33  ;;  %v468_v51 = vrot.slane %v466_v45, 1  ;;  %v4362_v8 = vld [vmem:[%s4201_s23 + $0x5c] ss:$0 sps:$4 sm:$0x11]   ;;  %v2813_v10 = vcombine.low %v353_v7, %v337_v2  ;;  %v336_v21 = vld [vmem:[%s4201_s23 + $0x54] sm:$0xf] }
  0x37   : > { %3536 = vmatmul.mubr.bf16.vlgmr.msra.gmra.mrb[0].mxu1 %v4240_v55  ;;  %3553 = vmatprep.subr.bf16.mxu0 %v4024_v47  ;;  %v3813_v27 = vld [vmem:[%s4976_s2 + $0x160] sm:$0xff]   ;;  %v3814_v29 = vld [vmem:[%s4976_s2 + $0xf8] sm:$0xff]   ;;  %v3815_v37 = vld [vmem:[%s4976_s2 + $0x168] sm:$0xff]   ;;  %s3665_s27 = smul.u32 3, %s5001_s13 }
  0x38   : > { %3312 = vmatpush3.bf16.msra.mxu1 %v3778_v53  ;;  %3539 = vmatprep.mubr.bf16.mxu1 %v4276_v14  ;;  %v571_v49 = vrot.slane %v2811_v41, 1  ;;  %v577_v17 = vrot.slane %v2813_v10, 1  ;;  %v3817_v45 = vld [vmem:[%s4976_s2 + $0xc0] sm:$0xff]   ;;  %v3825_v7 = vld [vmem:[%s4976_s2 + $0xd8] sm:$0xff]   ;;  %s4985_s13 = smul.u32 54, %s4153_s11 }
  0x39   : > { %3313 = vmatprep.subr.bf16.mxu1 %v3779_v57  ;;  %v469_v57 = vor.u32 %v468_v51, %v464_v44  ;;  %v3819_v51 = vld [vmem:[%s4976_s2 + $0x108] sm:$0xff]   ;;  %v3828_v10 = vld [vmem:[%s4976_s2 + $0xe0] sm:$0xff]  }
  0x3a   : > { %3554 = vmatpush3.bf16.msra.mxu0 %v3780_v59  ;;  %v4334_v53 = vsel %vm555_vm1, %v571_v49, %v572_v43  ;;  %v352_v59 = vld [vmem:[%s4201_s23 + $0x48] sm:$0xe]  ;;  %v3818_v49 = vld [vmem:[%s4976_s2 + $0x170] sm:$0xff]   ;;  %s314_s26 = sadd.s32 %s3665_s27, %s4985_s13  ;;  %s4026_s13 = smov [#allocation3]  }
  0x3b   : > { %3555 = vmatprep.subr.bf16.mxu0 %v4024_v47  ;;  %v2812_v1 = vcombine.low %v352_v59, %v335_v58  ;;  %v519_v59 = vshll.u32 %v4362_v8, 16  ;;  %s2789_s9 = sshll.u32 %s314_s26, 2 }
  0x3c   : > { %3314 = vmatpush3.bf16.msra.mxu1 %v3781_v0  ;;  %v4353_v0 = vsel %vm426_vm0, %v469_v57, %v473_v54  ;;  %v3820_v57 = vld [vmem:[%s4976_s2 + $0xc8] sm:$0xff]   ;;  %s4494_s27 = scalar_lea.vmem %s4975_s1, %s2789_s9  ;;  %s3152_s9 = sshll.u32 %s4010_s19, 5 }
  0x3d   : > { %3315 = vmatprep.subr.bf16.mxu1 %v3788_v3  ;;  %887 = vmatmul.mubr.bf16.gmra.mrb[4].mxu0 %v4222_v40  ;;  %v334_v3 = vld [vmem:[%s4201_s23 + $0x48] sm:$0xf]  ;;  %v574_v9 = vrot.slane %v2812_v1, 1  ;;  %v3823_v1 = vld [vmem:[%s4976_s2 + $0xd0] sm:$0xff]   ;;  %s3181_s23 = sshll.u32 %s4006_s18, 4 }
  0x3e   : > { %3556 = vmatpush3.bf16.msra.mxu0 %v3791_v13  ;;  %894 = vmatprep.mubr.bf16.mxu0 %v4308_v35  ;;  %v578_v13 = vrot.slane %v4362_v8, 1  ;;  %v4382_v23 = vcombine.low %v334_v3, %v335_v58  ;;  %v3827_v8 = vld [vmem:[%s4976_s2 + $0x120] sm:$0xff]   ;;  %s2618_s24 = sadd.s32 %s3181_s23, %s3152_s9 }
  0x3f   : > { %3540 = vmatmul.mubr.bf16.gmra.mrb[4].mxu1 %v4288_v22  ;;  %3557 = vmatprep.subr.bf16.mxu0 %v4024_v47  ;;  %v4373_v16 = vsel %vm555_vm1, %v574_v9, %v575_v6  ;;  %v521_v6 = vrot.slane %v519_v59, 1  ;;  %v3852_v59 = vld [vmem:[%s4976_s2 + $0x1a0] sm:$0xff]   ;;  %s3153_s30 = sshll.u32 %s2618_s24, 6 }
  0x40   : > { %3316 = vmatpush3.bf16.msra.mxu1 %v3789_v12  ;;  %3543 = vmatprep.mubr.bf16.mxu1 %v4319_v42  ;;  %v4367_v12 = vcombine.low %v332_v63, %v333_v33  ;;  %v4385_v24 = vsel %vm555_vm1, %v577_v17, %v578_v13  ;;  %v502_v43 = vshll.u32 %v4382_v23, 16  ;;  %v3822_v63 = vld [vmem:[%s4976_s2 + $0x178] sm:$0xff]   ;;  %v3831_v13 = vld [vmem:[%s4976_s2 + $0xe8] sm:$0xff]   ;;  %v3834_v17 = vld [vmem:[%s4976_s2 + $0xf0] sm:$0xff]   ;;  %s4884_s6 = scalar_lea.hbm %s4977_s3, %s3153_s30 }
  0x41   : > { %3317 = vmatprep.subr.bf16.mxu1 %v3790_v19  ;;  %v483_v19 = vshll.u32 %v4300_v30, 16 }
  0x42   : > { %3558 = vmatpush3.bf16.msra.mxu0 %v3802_v52  ;;  %v488_v30 = vshrl.u32 %v4367_v12, 16  ;;  %v490_v31 = vshll.u32 %v4367_v12, 16  ;;  %v504_v48 = vrot.slane %v502_v43, 1 }
  0x43   : > { %3559 = vmatprep.subr.bf16.mxu0 %v4024_v47  ;;  %v485_v26 = vrot.slane %v483_v19, 1  ;;  %v3826_v19 = vld [vmem:[%s4976_s2 + $0x140] sm:$0xff]  }
  0x44   : > { %3318 = vmatpush3.bf16.msra.mxu1 %v3792_v25  ;;  %v480_v25 = vrot.slane %v478_v18, 1  ;;  %v492_v34 = vrot.slane %v490_v31, 1  ;;  %v3836_v18 = vld [vmem:[%s4976_s2 + $0x138] sm:$0xff]  }
  0x45   : > { %3319 = vmatprep.subr.bf16.mxu1 %v3799_v32  ;;  %895 = vmatmul.mubr.bf16.gmra.mrb[8].mxu0 %v4263_v5  ;;  %v495_v32 = vshll.u32 %v4312_v38, 16  ;;  %v3816_v38 = vld [vmem:[%s4976_s2 + $0x100] sm:$0xff]  }
  0x46   : > { %902 = vmatprep.mubr.bf16.mxu0 %v4353_v0  ;;  %v481_v33 = vor.u32 %v480_v25, %v476_v15  ;;  %3560 = vmatpush3.bf16.msra.mxu0 %v3813_v27  ;;  %v493_v44 = vor.u32 %v492_v34, %v488_v30  ;;  %v3833_v15 = vld [vmem:[%s4976_s2 + $0x130] sm:$0xff]   ;;  %v4522_v25 = vld [vmem:[%s4494_s27 + $0x4] sm:$0xf]  ;;  %v3829_v27 = vld [vmem:[%s4976_s2 + $0x148] sm:$0xff]  }
  0x47   : > { %3544 = vmatmul.mubr.bf16.gmra.mrb[8].mxu1 %v4334_v53  ;;  %v497_v36 = vrot.slane %v495_v32, 1  ;;  %3561 = vmatprep.subr.bf16.mxu0 %v4024_v47  ;;  %v4539_v30 = vld [vmem:[%s4494_s27 + $0x8] ss:$0 sps:$4 sm:$0x11]   ;;  %v3835_v32 = vld [vmem:[%s4976_s2 + $0x158] sm:$0xff]  }
  0x48   : > { %3320 = vmatpush3.bf16.msra.mxu1 %v3800_v39  ;;  %3547 = vmatprep.mubr.bf16.mxu1 %v4373_v16  ;;  %v4411_v39 = vcombine.low %v336_v21, %v337_v2  ;;  %v4414_v41 = vsel %vm426_vm0, %v481_v33, %v485_v26  ;;  %v3824_v2 = vld [vmem:[%s4976_s2 + $0x118] sm:$0xff]   ;;  %v588_v21 = vld [vmem:[%s4494_s27] sm:$0xf] }
  0x49   : > { %3321 = vmatprep.subr.bf16.mxu1 %v3801_v46  ;;  %v507_v46 = vshll.u32 %v4344_v60, 16  ;;  %v4428_v50 = vsel %vm426_vm0, %v493_v44, %v497_v36  ;;  %v3821_v60 = vld [vmem:[%s4976_s2 + $0x110] sm:$0xff]   ;;  %v3840_v26 = vld [vmem:[%s4976_s2 + $0x1c0] sm:$0xff]   ;;  %v622_v36 = vshll.u32 %v4539_v30, 16  ;;  %v3845_v44 = vld [vmem:[%s4976_s2 + $0x168] sm:$0xff]  }
  0x4a   : > { %3562 = vmatpush3.bf16.msra.mxu0 %v3815_v37  ;;  %v512_v58 = vshrl.u32 %v4411_v39, 16 }
  0x4b   : > { %v509_v54 = vrot.slane %v507_v46, 1  ;;  %3563 = vmatprep.subr.bf16.mxu0 %v4024_v47  ;;  %v3842_v46 = vld [vmem:[%s4976_s2 + $0x180] sm:$0xff]  }
  0x4c   : > { %3322 = vmatpush3.bf16.msra.mxu1 %v3803_v56  ;;  %v514_v56 = vshll.u32 %v4411_v39, 16 }
  0x4d   : > { %3323 = vmatprep.subr.bf16.mxu1 %v3810_v61  ;;  %903 = vmatmul.mubr.bf16.gmra.mrb[12].mxu0 %v4297_v28 }
  0x4e   : > { %910 = vmatprep.mubr.bf16.mxu0 %v4414_v41  ;;  %3564 = vmatpush3.bf16.msra.mxu0 %v3818_v49  ;;  %v516_v61 = vrot.slane %v514_v56, 1  ;;  %v3855_v49 = vld [vmem:[%s4976_s2 + $0x178] sm:$0xff]   ;;  %v3847_v56 = vld [vmem:[%s4976_s2 + $0x190] sm:$0xff]  }
  0x4f   : > { %3548 = vmatmul.mubr.bf16.gmra.mrb[12].mxu1 %v4385_v24  ;;  %3565 = vmatprep.subr.bf16.mxu0 %v4024_v47 }
  0x50   : > { %3324 = vmatpush3.bf16.msra.mxu1 %v3811_v11  ;;  %1295 = vmatprep.mubr.bf16.mxu1 %v4261_v4  ;;  %v500_v4 = vshrl.u32 %v4382_v23, 16  ;;  %v517_v3 = vor.u32 %v516_v61, %v512_v58  ;;  %v3830_v11 = vld [vmem:[%s4976_s2 + $0x128] sm:$0xff]   ;;  %v3851_v58 = vld [vmem:[%s4976_s2 + $0x1e0] sm:$0xff]  }
  0x51   : > { %3325 = vmatprep.subr.bf16.mxu1 %v3812_v20  ;;  %v3837_v20 = vld [vmem:[%s4976_s2 + $0xf8] sm:$0xff]   ;;  %v594_v61 = vld [vmem:[%s4494_s27] sm:$0xe] }
  0x52   : > { %v505_v52 = vor.u32 %v504_v48, %v500_v4  ;;  %3566 = vmatpush3.bf16.msra.mxu0 %v3822_v63  ;;  %v4480_v9 = vsel %vm426_vm0, %v517_v3, %v521_v6  ;;  %v3841_v4 = vld [vmem:[%s4976_s2 + $0x160] sm:$0xff]   ;;  %v3843_v48 = vld [vmem:[%s4976_s2 + $0x1c8] sm:$0xff]   ;;  %v3857_v3 = vld [vmem:[%s4976_s2 + $0x1b0] sm:$0xff]  }
  0x53   : > { %3595 = vmatprep.subr.bf16.mxu0 %v4024_v47  ;;  %v3854_v63 = vld [vmem:[%s4976_s2 + $0x1a8] sm:$0xff]  }
  0x54   : > { %3326 = vmatpush3.bf16.msra.mxu1 %v3814_v29  ;;  %v4534_v29 = vcombine.low %v588_v21, %v4522_v25  ;;  %v3867_v21 = vld [vmem:[%s4976_s2 + $0x220] sm:$0xff]  }
  0x55   : > { %3384 = vmatprep.subr.bf16.mxu1 %v3816_v38  ;;  %911 = vmatmul.mubr.bf16.gmra.mrb[16].mxu0 %v4349_v62  ;;  %v624_v38 = vrot.slane %v622_v36, 1  ;;  %v3880_v36 = vld [vmem:[%s4976_s2 + $0x208] sm:$0xff]  }
  0x56   : > { %918 = vmatprep.mubr.bf16.mxu0 %v4428_v50  ;;  %v617_v31 = vshll.u32 %v4534_v29, 16  ;;  %v615_v33 = vshrl.u32 %v4534_v29, 16 }
  0x57   : > { %1296 = vmatmul.mubr.bf16.vlgmr.msra.gmra.mrb[16].mxu1 %v4222_v40  ;;  %v4453_v40 = vsel %vm426_vm0, %v505_v52, %v509_v54  ;;  %v3844_v52 = vld [vmem:[%s4976_s2 + $0x188] sm:$0xff]   ;;  %v3846_v54 = vld [vmem:[%s4976_s2 + $0x1d0] sm:$0xff]  }
  0x58   : > { %3385 = vmatpush3.bf16.msra.mxu1 %v3817_v45  ;;  %1303 = vmatprep.mubr.bf16.mxu1 %v4308_v35  ;;  %v619_v34 = vrot.slane %v617_v31, 1  ;;  %v3850_v45 = vld [vmem:[%s4976_s2 + $0x170] sm:$0xff]  }
  0x59   : > { %3386 = vmatprep.subr.bf16.mxu1 %v3819_v51  ;;  %v3858_v51 = vld [vmem:[%s4976_s2 + $0x200] sm:$0xff]   ;;  %v3885_v31 = vld [vmem:[%s4976_s2 + $0x1f0] sm:$0xff]  }
  0x5a   : > { %v620_v37 = vor.u32 %v619_v34, %v615_v33  ;;  %v3877_v33 = vld [vmem:[%s4976_s2 + $0x200] sm:$0xff]   ;;  %v3889_v34 = vld [vmem:[%s4976_s2 + $0x1b8] sm:$0xff]  }
  0x5c   : > { %3387 = vmatpush3.bf16.msra.mxu1 %v3820_v57  ;;  %v4566_v43 = vsel %vm426_vm0, %v620_v37, %v624_v38  ;;  %v3849_v57 = vld [vmem:[%s4976_s2 + $0x198] sm:$0xff]   ;;  %v590_v37 = vld [vmem:[%s4494_s27 + $0xc] sm:$0xf]  ;;  %v591_v38 = vld [vmem:[%s4494_s27 + $0x10] sm:$0xf] }
  0x5d   : > { %919 = vmatmul.mubr.bf16.gmra.mrb[20].mxu0 %v4367_v12  ;;  %3388 = vmatprep.subr.bf16.mxu1 %v3821_v60  ;;  %v3853_v60 = vld [vmem:[%s4976_s2 + $0x1e8] sm:$0xff]  }
  0x5e   : > { %926 = vmatprep.mubr.bf16.mxu0 %v4453_v40 }
  0x5f   : > { %1304 = vmatmul.mubr.bf16.gmra.mrb[20].mxu1 %v4263_v5 }
  0x60   : > { %1311 = vmatprep.mubr.bf16.mxu1 %v4353_v0  ;;  %3389 = vmatpush3.bf16.msra.mxu1 %v3823_v1  ;;  %v3856_v1 = vld [vmem:[%s4976_s2 + $0x1f0] sm:$0xff]  }
  0x61   : > { %3390 = vmatprep.subr.bf16.mxu1 %v3824_v2  ;;  %v2818_v2 = vcombine.low %v594_v61, %v4522_v25  ;;  %v3876_v25 = vld [vmem:[%s4976_s2 + $0x198] sm:$0xff]  }
  0x63   : > { %v646_v6 = vrot.slane %v2818_v2, 1 }
  0x64   : > { %3391 = vmatpush3.bf16.msra.mxu1 %v3825_v7  ;;  %v647_v7 = vrot.slane %v4539_v30, 1  ;;  %v3873_v30 = vld [vmem:[%s4976_s2 + $0x230] sm:$0xff]  }
  0x65   : > { %927 = vmatmul.mubr.bf16.gmra.mrb[24].mxu0 %v4382_v23  ;;  %3392 = vmatprep.subr.bf16.mxu1 %v3827_v8  ;;  %v3860_v8 = vld [vmem:[%s4976_s2 + $0x1f8] sm:$0xff]  }
  0x66   : > { %934 = vmatprep.mubr.bf16.mxu0 %v4480_v9 }
  0x67   : > { %1312 = vmatmul.mubr.bf16.gmra.mrb[24].mxu1 %v4297_v28 }
  0x68   : > { %1319 = vmatprep.mubr.bf16.mxu1 %v4414_v41  ;;  %3393 = vmatpush3.bf16.msra.mxu1 %v3828_v10  ;;  %v3861_v10 = vld [vmem:[%s4976_s2 + $0x1b8] sm:$0xff]  }
  0x69   : > { %3394 = vmatprep.subr.bf16.mxu1 %v3830_v11  ;;  %v4648_v11 = vsel %vm555_vm1, %v646_v6, %v647_v7 }
  0x6c   : > { %3395 = vmatpush3.bf16.msra.mxu1 %v3831_v13  ;;  %v3862_v13 = vld [vmem:[%s4976_s2 + $0x208] sm:$0xff]  }
  0x6d   : > { %935 = vmatmul.mubr.bf16.gmra.mrb[28].mxu0 %v4411_v39  ;;  %3396 = vmatprep.subr.bf16.mxu1 %v3833_v15  ;;  %v3865_v15 = vld [vmem:[%s4976_s2 + $0x180] sm:$0xff]  }
  0x6e   : > { %3567 = vmatprep.mubr.msk.bf16.mxu0 %vm4025_vm2, %v4024_v47 }
  0x6f   : > { %1320 = vmatmul.mubr.bf16.gmra.mrb[28].mxu1 %v4349_v62 }
  0x70   : > { %1327 = vmatprep.mubr.bf16.mxu1 %v4428_v50  ;;  %3397 = vmatpush3.bf16.msra.mxu1 %v3834_v17  ;;  %v3868_v17 = vld [vmem:[%s4976_s2 + $0x1c8] sm:$0xff]  }
  0x71   : > { %3398 = vmatprep.subr.bf16.mxu1 %v3836_v18  ;;  %v3863_v18 = vld [vmem:[%s4976_s2 + $0x210] sm:$0xff]  }
  0x74   : > { %3399 = vmatpush3.bf16.msra.mxu1 %v3837_v20  ;;  %v3871_v20 = vld [vmem:[%s4976_s2 + $0x1d0] sm:$0xff]  }
  0x75   : > { %3568 = vmatmul.mubr.bf16.vlgmr.msra.gmra.mrb[32].mxu0 %v4240_v55  ;;  %3415 = vmatprep.subr.bf16.mxu1 %v3840_v26  ;;  %v3832_v55 = vld [vmem:[%s4976_s2 + $0x150] sm:$0xff]   ;;  %v3878_v26 = vld [vmem:[%s4976_s2 + $0x1e0] sm:$0xff]  }
  0x76   : > { %3596 = vmatpush3.bf16.msra.mxu0 %v3826_v19  ;;  %3571 = vmatprep.mubr.msk.bf16.mxu0 %vm4025_vm2, %v4024_v47  ;;  %v3869_v19 = vld [vmem:[%s4976_s2 + $0x188] sm:$0xff]  }
  0x77   : > { %3597 = vmatprep.subr.bf16.mxu0 %v4024_v47  ;;  %1328 = vmatmul.mubr.bf16.gmra.mrb[32].mxu1 %v4367_v12 }
  0x78   : > { %1335 = vmatprep.mubr.bf16.mxu1 %v4453_v40 }
  0x7a   : > { %3598 = vmatpush3.bf16.msra.mxu0 %v3829_v27  ;;  %v3870_v27 = vld [vmem:[%s4976_s2 + $0x228] sm:$0xff]  }
  0x7b   : > { %3599 = vmatprep.subr.bf16.mxu0 %v4024_v47 }
  0x7d   : > { %3572 = vmatmul.mubr.bf16.gmra.mrb[36].mxu0 %v4276_v14 }
  0x7e   : > { %3575 = vmatprep.mubr.msk.bf16.mxu0 %vm4025_vm2, %v4024_v47  ;;  %3600 = vmatpush3.bf16.msra.mxu0 %v3832_v55  ;;  %v3883_v55 = vld [vmem:[%s4976_s2 + $0x1a8] sm:$0xff]  }
  0x7f   : > { %3601 = vmatprep.subr.bf16.mxu0 %v4024_v47  ;;  %1336 = vmatmul.mubr.bf16.gmra.mrb[36].mxu1 %v4382_v23 }
  0x80   : > { %1343 = vmatprep.mubr.bf16.mxu1 %v4480_v9 }
  0x82   : > { %3602 = vmatpush3.bf16.msra.mxu0 %v3835_v32  ;;  %v3874_v32 = vld [vmem:[%s4976_s2 + $0x238] sm:$0xff]  }
  0x83   : > { %3603 = vmatprep.subr.bf16.mxu0 %v4024_v47 }
  0x85   : > { %3576 = vmatmul.mubr.bf16.gmra.mrb[40].mxu0 %v4288_v22 }
  0x86   : > { %3579 = vmatprep.mubr.msk.bf16.mxu0 %vm4025_vm2, %v4024_v47  ;;  %3604 = vmatpush3.bf16.msra.mxu0 %v3841_v4  ;;  %v3893_v4 = vld [vmem:[%s4494_s27 + $0x14] ss:$0 sps:$4 sm:$0x11]  }
  0x87   : > { %3605 = vmatprep.subr.bf16.mxu0 %v4024_v47  ;;  %1344 = vmatmul.mubr.bf16.gmra.mrb[40].mxu1 %v4411_v39 }
  0x88   : > { %1695 = vmatprep.mubr.bf16.mxu1 %v4566_v43 }
  0x8a   : > { %3606 = vmatpush3.bf16.msra.mxu0 %v3845_v44 }
  0x8b   : > { %3607 = vmatprep.subr.bf16.mxu0 %v4024_v47 }
  0x8d   : > { %3580 = vmatmul.mubr.bf16.gmra.mrb[44].mxu0 %v4319_v42 }
  0x8e   : > { %3583 = vmatprep.mubr.msk.bf16.mxu0 %vm4025_vm2, %v4024_v47  ;;  %3608 = vmatpush3.bf16.msra.mxu0 %v3850_v45 }
  0x8f   : > { %3609 = vmatprep.subr.bf16.mxu0 %v4024_v47  ;;  %1696 = vmatmul.mubr.bf16.vlgmr.msra.gmra.mrb[44].mxu1 %v4534_v29 }
  0x90   : > { %3416 = vmatpush3.bf16.msra.mxu1 %v3842_v46  ;;  %1986 = vmatprep.mubr.bf16.mxu1 %v4308_v35  ;;  %v3848_v35 = vld [vmem:[%s4976_s2 + $0x1d8] sm:$0xff]   ;;  %v634_v46 = vshll.u32 %v3893_v4, 16 }
  0x91   : > { %3417 = vmatprep.subr.bf16.mxu1 %v3843_v48 }
  0x92   : > { %3610 = vmatpush3.bf16.msra.mxu0 %v3855_v49  ;;  %v636_v48 = vrot.slane %v634_v46, 1 }
  0x93   : > { %3615 = vmatprep.subr.bf16.mxu0 %v3858_v51 }
  0x94   : > { %3418 = vmatpush3.bf16.msra.mxu1 %v3844_v52  ;;  %v650_v52 = vrot.slane %v3893_v4, 1 }
  0x95   : > { %3584 = vmatmul.mubr.bf16.gmra.mrb[48].mxu0 %v4334_v53  ;;  %3419 = vmatprep.subr.bf16.mxu1 %v3846_v54 }
  0x96   : > { %3587 = vmatprep.mubr.msk.bf16.mxu0 %vm4025_vm2, %v4024_v47 }
  0x98   : > { %3420 = vmatpush3.bf16.msra.mxu1 %v3847_v56 }
  0x99   : > { %3421 = vmatprep.subr.bf16.mxu1 %v3848_v35 }
  0x9c   : > { %3422 = vmatpush3.bf16.msra.mxu1 %v3849_v57 }
  0x9d   : > { %3588 = vmatmul.mubr.bf16.gmra.mrb[52].mxu0 %v4373_v16  ;;  %3423 = vmatprep.subr.bf16.mxu1 %v3851_v58 }
  0x9e   : > { %3591 = vmatprep.mubr.msk.bf16.mxu0 %vm4025_vm2, %v4024_v47 }
  0xa0   : > { %3424 = vmatpush3.bf16.msra.mxu1 %v3852_v59 }
  0xa1   : > { %3425 = vmatprep.subr.bf16.mxu1 %v3853_v60 }
  0xa4   : > { %3426 = vmatpush3.bf16.msra.mxu1 %v3854_v63 }
  0xa5   : > { %3592 = vmatmul.mubr.bf16.gmra.mrb[56].mxu0 %v4385_v24  ;;  %3427 = vmatprep.subr.bf16.mxu1 %v3856_v1 }
  0xa6   : > { %3611 = vmatprep.mubr.msk.bf16.mxu0 %vm4025_vm2, %v4024_v47  ;;  %v3864_v47 = vld [vmem:[%s4976_s2 + $0x1c0] sm:$0xff]  }
  0xa8   : > { %3428 = vmatpush3.bf16.msra.mxu1 %v3857_v3 }
  0xa9   : > { %3429 = vmatprep.subr.bf16.mxu1 %v3860_v8 }
  0xac   : > { %3430 = vmatpush3.bf16.msra.mxu1 %v3861_v10 }
  0xad   : > { %3612 = vmatmul.mubr.bf16.vlgmr.msra.gmra.mrb[60].mxu0 %v4648_v11  ;;  %3481 = vmatprep.subr.bf16.mxu1 %v3864_v47 }
  0xae   : > { %3616 = vmatpush3.bf16.msra.mxu0 %v3858_v51  ;;  %3631 = vmatprep.mubr.bf16.mxu0 %v4276_v14  ;;  %v3866_v14 = vld [vmem:[%s4976_s2 + $0x218] sm:$0xff]  }
  0xaf   : > { %3617 = vmatprep.subr.bf16.mxu0 %v3862_v13  ;;  %1987 = vmatmul.mubr.bf16.vlgmr.msra.gmra.mrb[48].mxu1 %v4263_v5  ;;  %v3872_v5 = vld [vmem:[%s4976_s2 + $0x190] sm:$0xff]  }
  0xb0   : > { %3482 = vmatpush3.bf16.msra.mxu1 %v3865_v15  ;;  %1994 = vmatprep.mubr.bf16.mxu1 %v4353_v0  ;;  %v3875_v0 = vld [vmem:[%s4976_s2 + $0x1d8] sm:$0xff]  }
  0xb1   : > { %3483 = vmatprep.subr.bf16.mxu1 %v3868_v17 }
  0xb2   : > { %3618 = vmatpush3.bf16.msra.mxu0 %v3862_v13 }
  0xb3   : > { %3619 = vmatprep.subr.bf16.mxu0 %v3863_v18 }
  0xb4   : > { %3484 = vmatpush3.bf16.msra.mxu1 %v3869_v19 }
  0xb5   : > { %3485 = vmatprep.subr.bf16.mxu1 %v3871_v20 }
  0xb6   : > { %3620 = vmatpush3.bf16.msra.mxu0 %v3863_v18 }
  0xb7   : > { %3621 = vmatprep.subr.bf16.mxu0 %v3866_v14  ;;  %1995 = vmatmul.mubr.bf16.gmra.mrb[52].mxu1 %v4297_v28  ;;  %v3879_v28 = vld [vmem:[%s4976_s2 + $0x1a0] sm:$0xff]  }
  0xb8   : > { %2002 = vmatprep.mubr.bf16.mxu1 %v4414_v41  ;;  %3486 = vmatpush3.bf16.msra.mxu1 %v3872_v5  ;;  %v3881_v41 = vld [vmem:[%s4976_s2 + $0x1e8] sm:$0xff]  }
  0xb9   : > { %3487 = vmatprep.subr.bf16.mxu1 %v3875_v0 }
  0xba   : > { %3622 = vmatpush3.bf16.msra.mxu0 %v3866_v14 }
  0xbb   : > { %3623 = vmatprep.subr.bf16.mxu0 %v3867_v21 }
  0xbc   : > { %3488 = vmatpush3.bf16.msra.mxu1 %v3876_v25 }
  0xbd   : > { %3489 = vmatprep.subr.bf16.mxu1 %v3878_v26 }
  0xbe   : > { %3624 = vmatpush3.bf16.msra.mxu0 %v3867_v21 }
  0xbf   : > { %3625 = vmatprep.subr.bf16.mxu0 %v3870_v27  ;;  %2003 = vmatmul.mubr.bf16.gmra.mrb[56].mxu1 %v4349_v62  ;;  %v3886_v62 = vld [vmem:[%s4976_s2 + $0x1b0] sm:$0xff]  }
  0xc0   : > { %2010 = vmatprep.mubr.bf16.mxu1 %v4428_v50  ;;  %3490 = vmatpush3.bf16.msra.mxu1 %v3879_v28  ;;  %v3888_v50 = vld [vmem:[%s4976_s2 + $0x1f8] sm:$0xff]  }
  0xc1   : > { %3491 = vmatprep.subr.bf16.mxu1 %v3881_v41 }
  0xc2   : > { %3626 = vmatpush3.bf16.msra.mxu0 %v3870_v27 }
  0xc3   : > { %3627 = vmatprep.subr.bf16.mxu0 %v3873_v30 }
  0xc4   : > { %3492 = vmatpush3.bf16.msra.mxu1 %v3883_v55 }
  0xc5   : > { %3493 = vmatprep.subr.bf16.mxu1 %v3885_v31 }
  0xc6   : > { %3628 = vmatpush3.bf16.msra.mxu0 %v3873_v30 }
  0xc7   : > { %3629 = vmatprep.subr.bf16.mxu0 %v3874_v32  ;;  %2011 = vmatmul.mubr.bf16.gmra.mrb[60].mxu1 %v4367_v12  ;;  %v2815_v12 = vcombine.low %v590_v37, %v591_v38 }
  0xc8   : > { %2018 = vmatprep.mubr.bf16.mxu1 %v4453_v40  ;;  %3494 = vmatpush3.bf16.msra.mxu1 %v3886_v62  ;;  %v3882_v40 = vld [vmem:[%s4976_s2 + $0x210] sm:$0xff]  }
  0xc9   : > { %3495 = vmatprep.subr.bf16.mxu1 %v3888_v50  ;;  %v629_v44 = vshll.u32 %v2815_v12, 16 }
  0xca   : > { %3630 = vmatpush3.bf16.msra.mxu0 %v3874_v32 }
  0xcb   : > { %3643 = vmatprep.subr.bf16.mxu0 %v3877_v33  ;;  %v631_v45 = vrot.slane %v629_v44, 1 }
  0xcc   : > { %3496 = vmatpush3.bf16.msra.mxu1 %v3889_v34 }
  0xcd   : > { %3632 = vmatmul.mubr.bf16.vlgmr.msra.gmra.mrb[64].mxu0 %v4288_v22  ;;  %v3884_v22 = vld [vmem:[%s4976_s2 + $0x218] sm:$0xff]  }
  0xce   : > { %3644 = vmatpush3.bf16.msra.mxu0 %v3877_v33  ;;  %3635 = vmatprep.mubr.bf16.mxu0 %v4319_v42  ;;  %v627_v42 = vshrl.u32 %v2815_v12, 16 }
  0xcf   : > { %3645 = vmatprep.subr.bf16.mxu0 %v3880_v36  ;;  %2019 = vmatmul.mubr.bf16.gmra.mrb[64].mxu1 %v4382_v23  ;;  %v3887_v23 = vld [vmem:[%s4976_s2 + $0x220] sm:$0xff]  }
  0xd0   : > { %2026 = vmatprep.mubr.bf16.mxu1 %v4480_v9  ;;  %v632_v9 = vor.u32 %v631_v45, %v627_v42 }
  0xd2   : > { %3646 = vmatpush3.bf16.msra.mxu0 %v3880_v36 }
  0xd3   : > { %3647 = vmatprep.subr.bf16.mxu0 %v3882_v40 }
  0xd5   : > { %3636 = vmatmul.mubr.bf16.gmra.mrb[68].mxu0 %v4334_v53  ;;  %v3890_v53 = vld [vmem:[%s4976_s2 + $0x228] sm:$0xff]  }
  0xd6   : > { %3648 = vmatpush3.bf16.msra.mxu0 %v3882_v40  ;;  %3639 = vmatprep.mubr.bf16.mxu0 %v4373_v16  ;;  %v637_v16 = vsel %vm426_vm0, %v632_v9, %v636_v48 }
  0xd7   : > { %3649 = vmatprep.subr.bf16.mxu0 %v3884_v22  ;;  %2027 = vmatmul.mubr.bf16.gmra.mrb[68].mxu1 %v4411_v39  ;;  %v3891_v39 = vld [vmem:[%s4976_s2 + $0x230] sm:$0xff]  }
  0xd8   : > { %2368 = vmatprep.mubr.bf16.mxu1 %v4566_v43  ;;  %v595_v43 = vld [vmem:[%s4494_s27 + $0xc] sm:$0xe]  ;;  %s4851_s27 = sand.u32 1, %s3998_s16  }
  0xd9   : > { %v2819_v49 = vcombine.low %v595_v43, %v591_v38  ;;  %s2783_s26 = sshll.u32 %s4851_s27, 6  ;;  %s2600_s14 = scalar_lea.sflag [#allocation4], %s4851_s27 }
  0xda   : > { %3650 = vmatpush3.bf16.msra.mxu0 %v3884_v22  ;;  %s4858_s10 = scalar_lea.vmem [#allocation3], %s2783_s26  ;;  %s3900_s26 = sshll.u32 %s4026_s13, 4  ;;  %s3901_s26 = int_to_ptr.vmem [resolvable:$false] %s3900_s26 }
  0xdb   : > { %3651 = vmatprep.subr.bf16.mxu0 %v3887_v23  ;;  %v649_v51 = vrot.slane %v2819_v49, 1  ;;  %s2621_s11 = sshll.u32 %s4858_s10, 4  ;;  %s3902_s23 = scalar_lea.vmem %s3901_s26, 2048  ;;  %s4886_s11 = int_to_ptr.vmem [resolvable:$true] %s2621_s11 }
  0xdc   : > { %s3896_s12 = scalar_lea.vmem %s4886_s11, 1024  ;;  %p3903_p5 = scmp.lt.s32.totalorder %s4886_s11, %s3901_s26 }
  0xdd   : > { %3640 = vmatmul.mubr.bf16.gmra.mrb[72].mxu0 %v4385_v24  ;;  %v3894_v24 = vld [vmem:[%s4976_s2 + $0x238] sm:$0xff]   ;;  %v651_v54 = vsel %vm555_vm1, %v649_v51, %v650_v52  ;;  %p3897_p1 = scmp.ne.s32.totalorder %s4886_s11, %s3896_s12  ;;  %p3904_p6 = scmp.lt.s32.totalorder %s3902_s23, %s3896_s12 }
  0xde   : > { %3652 = vmatpush3.bf16.msra.mxu0 %v3887_v23  ;;  %3659 = vmatprep.mubr.bf16.mxu0 %v4648_v11 }
  0xdf   : > { %3653 = vmatprep.subr.bf16.mxu0 %v3890_v53  ;;  %2369 = vmatmul.mubr.bf16.vlgmr.msra.gmra.mrb[72].mxu1 %v4534_v29  ;;  %p3898_p2 = pnand %p3897_p1, %p4106_p3  ;;  %p3905_p7 = por %p3904_p6, %p3903_p5 }
  0xe0   : > { %2376 = vmatprep.mubr.bf16.mxu1 %v637_v16 }
  0xe1   : > { %p3899_p4 = pneg %p3898_p2 }
  0xe2   : > { %3654 = vmatpush3.bf16.msra.mxu0 %v3890_v53 }
  0xe3   : > { %3655 = vmatprep.subr.bf16.mxu0 %v3891_v39  ;;  %p3906_p9 = pnand %p3905_p7, %p3899_p4 }
  0xe6   : > { %3656 = vmatpush3.bf16.msra.mxu0 %v3891_v39 }
  0xe7   : > { %3657 = vmatprep.subr.bf16.mxu0 %v3894_v24  ;;  %2377 = vmatmul.mubr.bf16.gmra.mrb[76].mxu1 %v2815_v12 }
  0xea   : > { %3658 = vmatpush3.bf16.msra.mxu0 %v3894_v24 }
  0xed   : > { %3660 = vmatmul.mubr.bf16.vlgmr.msra.gmra.mrb[76].mxu0 %v651_v54 }
 0x108   : > { %v3247_v56 = vpop.f32.mrb[0].mxu0 }
 0x109   : > { %v3248_v35 = vpop.f32.mrb[1].mxu0 }
 0x10a   : > { %v3537_v29 = vpop.f32.mrb[0].mxu1  ;;  %v3249_v57 = vadd.f32 %v3248_v35, %v3247_v56  ;;  %v3250_v58 = vpop.f32.mrb[2].mxu0 }
 0x10b   : > { %v977_v59 = vpop.f32.mrb[1].mxu1  ;;  %v3251_v60 = vpop.f32.mrb[3].mxu0 }
 0x10c   : > { %v3538_v61 = vpop.f32.mrb[2].mxu1  ;;  %v3252_v63 = vadd.f32 %v3251_v60, %v3250_v58  ;;  %v4770_v1 = vadd.f32 %v3249_v57, %v977_v59 }
 0x10d   : > { %v980_v2 = vpop.f32.mrb[3].mxu1 }
 0x10e   : > { %v4772_v3 = vadd.f32 %v3252_v63, %v980_v2 }
 0x110   : > { %v3253_v6 = vpop.f32.mrb[4].mxu0 }
 0x111   : > { %v3254_v7 = vpop.f32.mrb[5].mxu0 }
 0x112   : > { %v3541_v8 = vpop.f32.mrb[4].mxu1  ;;  %v3255_v10 = vadd.f32 %v3254_v7, %v3253_v6  ;;  %v3256_v11 = vpop.f32.mrb[6].mxu0 }
 0x113   : > { %v993_v47 = vpop.f32.mrb[5].mxu1  ;;  %v3257_v13 = vpop.f32.mrb[7].mxu0 }
 0x114   : > { %v3542_v15 = vpop.f32.mrb[6].mxu1  ;;  %v4774_v17 = vadd.f32 %v3537_v29, %v3255_v10  ;;  %v3258_v18 = vadd.f32 %v3257_v13, %v3256_v11 }
 0x115   : > { %v996_v19 = vpop.f32.mrb[7].mxu1 }
 0x116   : > { %v4776_v20 = vadd.f32 %v3538_v61, %v3258_v18 }
 0x118   : > { %v3259_v14 = vpop.f32.mrb[8].mxu0 }
 0x119   : > { %v3260_v5 = vpop.f32.mrb[9].mxu0 }
 0x11a   : > { %v3261_v0 = vadd.f32 %v3260_v5, %v3259_v14  ;;  %v3262_v21 = vpop.f32.mrb[10].mxu0  ;;  %v3545_v26 = vpop.f32.mrb[8].mxu1 }
 0x11b   : > { %v3263_v25 = vpop.f32.mrb[11].mxu0  ;;  %v1009_v41 = vpop.f32.mrb[9].mxu1 }
 0x11c   : > { %v4778_v27 = vadd.f32 %v3261_v0, %v993_v47  ;;  %v3264_v28 = vadd.f32 %v3263_v25, %v3262_v21  ;;  %v3546_v30 = vpop.f32.mrb[10].mxu1 }
 0x11d   : > { %v1012_v31 = vpop.f32.mrb[11].mxu1 }
 0x11e   : > { %v4780_v55 = vadd.f32 %v3264_v28, %v996_v19 }
 0x120   : > { %v3265_v32 = vpop.f32.mrb[12].mxu0 }
 0x121   : > { %v3266_v62 = vpop.f32.mrb[13].mxu0 }
 0x122   : > { %v3267_v50 = vadd.f32 %v3266_v62, %v3265_v32  ;;  %v3268_v33 = vpop.f32.mrb[14].mxu0  ;;  %v3549_v38 = vpop.f32.mrb[12].mxu1 }
 0x123   : > { %v3269_v34 = vpop.f32.mrb[15].mxu0  ;;  %v1025_v12 = vpop.f32.mrb[13].mxu1 }
 0x124   : > { %v4782_v36 = vadd.f32 %v3541_v8, %v3267_v50  ;;  %v3270_v37 = vadd.f32 %v3269_v34, %v3268_v33  ;;  %v3550_v4 = vpop.f32.mrb[14].mxu1 }
 0x125   : > { %v1028_v44 = vpop.f32.mrb[15].mxu1 }
 0x126   : > { %v4784_v40 = vadd.f32 %v3542_v15, %v3270_v37 }
 0x128   : > { %v3271_v22 = vpop.f32.mrb[16].mxu0 }
 0x129   : > { %v3272_v42 = vpop.f32.mrb[17].mxu0 }
 0x12a   : > { %v3273_v45 = vadd.f32 %v3272_v42, %v3271_v22  ;;  %v3274_v46 = vpop.f32.mrb[18].mxu0  ;;  %v3327_v9 = vpop.f32.mrb[16].mxu1 }
 0x12b   : > { %v3275_v23 = vpop.f32.mrb[19].mxu0  ;;  %v3328_v16 = vpop.f32.mrb[17].mxu1 }
 0x12c   : > { %v4786_v48 = vadd.f32 %v3273_v45, %v1009_v41  ;;  %v3276_v53 = vadd.f32 %v3275_v23, %v3274_v46  ;;  %v3329_v39 = vadd.f32 %v3328_v16, %v3327_v9  ;;  %v3330_v43 = vpop.f32.mrb[18].mxu1 }
 0x12d   : > { %v3331_v24 = vpop.f32.mrb[19].mxu1 }
 0x12e   : > { %v4788_v49 = vadd.f32 %v3276_v53, %v1012_v31  ;;  %v3332_v51 = vadd.f32 %v3331_v24, %v3330_v43 }
 0x130   : > { %v3277_v52 = vpop.f32.mrb[20].mxu0 }
 0x131   : > { %v3278_v54 = vpop.f32.mrb[21].mxu0 }
 0x132   : > { %v3279_v56 = vadd.f32 %v3278_v54, %v3277_v52  ;;  %v3280_v35 = vpop.f32.mrb[22].mxu0  ;;  %v3333_v57 = vpop.f32.mrb[20].mxu1 }
 0x133   : > { %v3281_v29 = vpop.f32.mrb[23].mxu0  ;;  %v3334_v60 = vpop.f32.mrb[21].mxu1 }
 0x134   : > { %v4790_v58 = vadd.f32 %v3545_v26, %v3279_v56  ;;  %v3282_v59 = vadd.f32 %v3281_v29, %v3280_v35  ;;  %v3335_v61 = vadd.f32 %v3334_v60, %v3333_v57  ;;  %v3336_v63 = vpop.f32.mrb[22].mxu1 }
 0x135   : > { %v3337_v6 = vpop.f32.mrb[23].mxu1 }
 0x136   : > { %v4792_v2 = vadd.f32 %v3546_v30, %v3282_v59  ;;  %v3338_v7 = vadd.f32 %v3337_v6, %v3336_v63 }
 0x138   : > { %v3283_v8 = vpop.f32.mrb[24].mxu0 }
 0x139   : > { %v3284_v10 = vpop.f32.mrb[25].mxu0 }
 0x13a   : > { %v3285_v11 = vadd.f32 %v3284_v10, %v3283_v8  ;;  %v3286_v47 = vpop.f32.mrb[26].mxu0  ;;  %v3339_v15 = vpop.f32.mrb[24].mxu1 }
 0x13b   : > { %v3287_v13 = vpop.f32.mrb[27].mxu0  ;;  %v3340_v14 = vpop.f32.mrb[25].mxu1 }
 0x13c   : > { %v4794_v18 = vadd.f32 %v3285_v11, %v1025_v12  ;;  %v3288_v19 = vadd.f32 %v3287_v13, %v3286_v47  ;;  %v3341_v5 = vadd.f32 %v3340_v14, %v3339_v15  ;;  %v3342_v0 = vpop.f32.mrb[26].mxu1 }
 0x13d   : > { %v3343_v25 = vpop.f32.mrb[27].mxu1 }
 0x13e   : > { %v4796_v21 = vadd.f32 %v3288_v19, %v1028_v44  ;;  %v3344_v26 = vadd.f32 %v3343_v25, %v3342_v0 }
 0x140   : > { %v3289_v28 = vpop.f32.mrb[28].mxu0 }
 0x141   : > { %v3290_v41 = vpop.f32.mrb[29].mxu0 }
 0x142   : > { %v3291_v30 = vadd.f32 %v3290_v41, %v3289_v28  ;;  %v3292_v31 = vpop.f32.mrb[30].mxu0  ;;  %v3345_v62 = vpop.f32.mrb[28].mxu1 }
 0x143   : > { %v3293_v32 = vpop.f32.mrb[31].mxu0  ;;  %v3346_v34 = vpop.f32.mrb[29].mxu1 }
 0x144   : > { %v4798_v50 = vadd.f32 %v3549_v38, %v3291_v30  ;;  %v3294_v33 = vadd.f32 %v3293_v32, %v3292_v31  ;;  %v3347_v37 = vadd.f32 %v3346_v34, %v3345_v62  ;;  %v3348_v12 = vpop.f32.mrb[30].mxu1 }
 0x145   : > { %v3349_v42 = vpop.f32.mrb[31].mxu1 }
 0x146   : > { %v4800_v22 = vadd.f32 %v3550_v4, %v3294_v33  ;;  %v3350_v45 = vadd.f32 %v3349_v42, %v3348_v12 }
 0x148   : > { %v1386_v44 = vpop.f32.mrb[32].mxu0 }
 0x149   : > { %v1387_v46 = vadd.f32 %v3329_v39, %v1386_v44  ;;  %v3569_v23 = vpop.f32.mrb[33].mxu0 }
 0x14a   : > { %v1389_v9 = vpop.f32.mrb[34].mxu0  ;;  %v3351_v24 = vpop.f32.mrb[32].mxu1 }
 0x14b   : > { %v4803_v53 = vadd.f32 %v1387_v46, %v4770_v1  ;;  %v1390_v16 = vadd.f32 %v3332_v51, %v1389_v9  ;;  %v3570_v43 = vpop.f32.mrb[35].mxu0  ;;  %v3352_v38 = vpop.f32.mrb[33].mxu1 }
 0x14c   : > { %v3353_v54 = vadd.f32 %v3352_v38, %v3351_v24  ;;  %v3354_v56 = vpop.f32.mrb[34].mxu1 }
 0x14d   : > { %v4806_v52 = vadd.f32 %v1390_v16, %v4772_v3  ;;  %v3355_v4 = vpop.f32.mrb[35].mxu1 }
 0x14e   : > { %v3356_v35 = vadd.f32 %v3355_v4, %v3354_v56 }
 0x150   : > { %v1394_v29 = vpop.f32.mrb[36].mxu0 }
 0x151   : > { %v1395_v57 = vadd.f32 %v3335_v61, %v1394_v29  ;;  %v3573_v59 = vpop.f32.mrb[37].mxu0 }
 0x152   : > { %v1397_v39 = vpop.f32.mrb[38].mxu0  ;;  %v3357_v51 = vpop.f32.mrb[36].mxu1 }
 0x153   : > { %v4809_v60 = vadd.f32 %v1395_v57, %v4774_v17  ;;  %v1398_v1 = vadd.f32 %v3338_v7, %v1397_v39  ;;  %v3574_v63 = vpop.f32.mrb[39].mxu0  ;;  %v3358_v6 = vpop.f32.mrb[37].mxu1 }
 0x154   : > { %v3359_v3 = vadd.f32 %v3358_v6, %v3357_v51  ;;  %v3360_v10 = vpop.f32.mrb[38].mxu1 }
 0x155   : > { %v4812_v8 = vadd.f32 %v1398_v1, %v4776_v20  ;;  %v3361_v11 = vpop.f32.mrb[39].mxu1 }
 0x156   : > { %v3362_v47 = vadd.f32 %v3361_v11, %v3360_v10 }
 0x158   : > { %v1402_v13 = vpop.f32.mrb[40].mxu0 }
 0x159   : > { %v1403_v15 = vadd.f32 %v3341_v5, %v1402_v13  ;;  %v3577_v19 = vpop.f32.mrb[41].mxu0 }
 0x15a   : > { %v1405_v61 = vpop.f32.mrb[42].mxu0  ;;  %v3363_v7 = vpop.f32.mrb[40].mxu1 }
 0x15b   : > { %v4815_v14 = vadd.f32 %v1403_v15, %v4778_v27  ;;  %v1406_v17 = vadd.f32 %v3344_v26, %v1405_v61  ;;  %v3578_v0 = vpop.f32.mrb[43].mxu0  ;;  %v3364_v25 = vpop.f32.mrb[41].mxu1 }
 0x15c   : > { %v3365_v20 = vadd.f32 %v3364_v25, %v3363_v7  ;;  %v3366_v41 = vpop.f32.mrb[42].mxu1 }
 0x15d   : > { %v4818_v28 = vadd.f32 %v1406_v17, %v4780_v55  ;;  %v3367_v30 = vpop.f32.mrb[43].mxu1 }
 0x15e   : > { %v3368_v31 = vadd.f32 %v3367_v30, %v3366_v41 }
 0x160   : > { %v1410_v32 = vpop.f32.mrb[44].mxu0 }
 0x161   : > { %v1411_v62 = vadd.f32 %v3347_v37, %v1410_v32  ;;  %v3581_v33 = vpop.f32.mrb[45].mxu0 }
 0x162   : > { %v1413_v5 = vpop.f32.mrb[46].mxu0  ;;  %v3400_v26 = vpop.f32.mrb[44].mxu1 }
 0x163   : > { %v4821_v34 = vadd.f32 %v1411_v62, %v4782_v36  ;;  %v1414_v27 = vadd.f32 %v3350_v45, %v1413_v5  ;;  %v3582_v12 = vpop.f32.mrb[47].mxu0  ;;  %v3401_v42 = vpop.f32.mrb[45].mxu1 }
 0x164   : > { %v3402_v55 = vadd.f32 %v3401_v42, %v3400_v26  ;;  %v3403_v46 = vpop.f32.mrb[46].mxu1 }
 0x165   : > { %v4824_v44 = vadd.f32 %v1414_v27, %v4784_v40  ;;  %v3404_v23 = vpop.f32.mrb[47].mxu1 }
 0x166   : > { %v3405_v9 = vadd.f32 %v3404_v23, %v3403_v46 }
 0x168   : > { %v1418_v16 = vpop.f32.mrb[48].mxu0 }
 0x169   : > { %v1419_v43 = vadd.f32 %v3353_v54, %v1418_v16  ;;  %v3585_v24 = vpop.f32.mrb[49].mxu0 }
 0x16a   : > { %v1421_v37 = vpop.f32.mrb[50].mxu0 }
 0x16b   : > { %v4827_v38 = vadd.f32 %v1419_v43, %v4786_v48  ;;  %v1422_v36 = vadd.f32 %v3356_v35, %v1421_v37  ;;  %v3586_v56 = vpop.f32.mrb[51].mxu0 }
 0x16d   : > { %v4830_v45 = vadd.f32 %v1422_v36, %v4788_v49 }
 0x170   : > { %v1426_v4 = vpop.f32.mrb[52].mxu0 }
 0x171   : > { %v1427_v29 = vadd.f32 %v3359_v3, %v1426_v4  ;;  %v3589_v40 = vpop.f32.mrb[53].mxu0 }
 0x172   : > { %v1429_v57 = vpop.f32.mrb[54].mxu0 }
 0x173   : > { %v4833_v59 = vadd.f32 %v1427_v29, %v4790_v58  ;;  %v1430_v39 = vadd.f32 %v3362_v47, %v1429_v57  ;;  %v3590_v1 = vpop.f32.mrb[55].mxu0 }
 0x175   : > { %v4836_v54 = vadd.f32 %v1430_v39, %v4792_v2 }
 0x178   : > { %v1434_v63 = vpop.f32.mrb[56].mxu0 }
 0x179   : > { %v1435_v48 = vadd.f32 %v3365_v20, %v1434_v63  ;;  %v3593_v51 = vpop.f32.mrb[57].mxu0 }
 0x17a   : > { %v1437_v35 = vpop.f32.mrb[58].mxu0 }
 0x17b   : > { %v4839_v6 = vadd.f32 %v1435_v48, %v4794_v18  ;;  %v1438_v49 = vadd.f32 %v3368_v31, %v1437_v35  ;;  %v3594_v10 = vpop.f32.mrb[59].mxu0 }
 0x17d   : > { %v4842_v3 = vadd.f32 %v1438_v49, %v4796_v21 }
 0x180   : > { %v1738_v11 = vpop.f32.mrb[60].mxu0 }
 0x181   : > { %v1739_v58 = vadd.f32 %v3402_v55, %v1738_v11  ;;  %v3613_v13 = vpop.f32.mrb[61].mxu0 }
 0x182   : > { %v1741_v47 = vpop.f32.mrb[62].mxu0  ;;  %v3431_v61 = vpop.f32.mrb[48].mxu1 }
 0x183   : > { %v4845_v15 = vadd.f32 %v1739_v58, %v4798_v50  ;;  %v1742_v2 = vadd.f32 %v3405_v9, %v1741_v47  ;;  %v3614_v19 = vpop.f32.mrb[63].mxu0  ;;  %v3432_v17 = vpop.f32.mrb[49].mxu1 }
 0x184   : > { %v3433_v18 = vadd.f32 %v3432_v17, %v3431_v61  ;;  %v3434_v7 = vpop.f32.mrb[50].mxu1 }
 0x185   : > { %v4848_v0 = vadd.f32 %v1742_v2, %v4800_v22  ;;  %v3435_v25 = vpop.f32.mrb[51].mxu1 }
 0x186   : > { %v3436_v20 = vadd.f32 %v3435_v25, %v3434_v7 }
 0x18a   : > { %v3437_v21 = vpop.f32.mrb[52].mxu1 }
 0x18b   : > { %v3438_v41 = vpop.f32.mrb[53].mxu1 }
 0x18c   : > { %v3439_v30 = vadd.f32 %v3438_v41, %v3437_v21  ;;  %v3440_v31 = vpop.f32.mrb[54].mxu1 }
 0x18d   : > { %v3441_v32 = vpop.f32.mrb[55].mxu1 }
 0x18e   : > { %v3442_v62 = vadd.f32 %v3441_v32, %v3440_v31 }
 0x192   : > { %v3443_v50 = vpop.f32.mrb[56].mxu1 }
 0x193   : > { %v3444_v33 = vpop.f32.mrb[57].mxu1 }
 0x194   : > { %v3445_v5 = vadd.f32 %v3444_v33, %v3443_v50  ;;  %v3446_v27 = vpop.f32.mrb[58].mxu1 }
 0x195   : > { %v3447_v12 = vpop.f32.mrb[59].mxu1 }
 0x196   : > { %v3448_v26 = vadd.f32 %v3447_v12, %v3446_v27 }
 0x19a   : > { %v3449_v42 = vpop.f32.mrb[60].mxu1 }
 0x19b   : > { %v3450_v22 = vpop.f32.mrb[61].mxu1 }
 0x19c   : > { %v3451_v55 = vadd.f32 %v3450_v22, %v3449_v42  ;;  %v3452_v46 = vpop.f32.mrb[62].mxu1 }
 0x19d   : > { %v3453_v23 = vpop.f32.mrb[63].mxu1 }
 0x19e   : > { %v3454_v9 = vadd.f32 %v3453_v23, %v3452_v46 }
 0x1a0   : > { %v3633_v16 = vpop.f32.mrb[64].mxu0 }
 0x1a1   : > { %v2078_v43 = vadd.f32 %v3633_v16, %v3439_v30  ;;  %v2069_v24 = vpop.f32.mrb[65].mxu0 }
 0x1a2   : > { %v2070_v37 = vadd.f32 %v3433_v18, %v2069_v24  ;;  %v3634_v36 = vpop.f32.mrb[66].mxu0  ;;  %v3455_v40 = vpop.f32.mrb[64].mxu1 }
 0x1a3   : > { %v2118_v56 = vadd.f32 %v2078_v43, %v4809_v60  ;;  %v2081_v4 = vadd.f32 %v3634_v36, %v3442_v62  ;;  %v2072_v29 = vpop.f32.mrb[67].mxu0  ;;  %v3456_v1 = vpop.f32.mrb[65].mxu1 }
 0x1a4   : > { %v2116_v57 = vadd.f32 %v2070_v37, %v4803_v53  ;;  %v2073_v39 = vadd.f32 %v3436_v20, %v2072_v29  ;;  %v3457_v48 = vadd.f32 %v3456_v1, %v3455_v40  ;;  %v3458_v51 = vpop.f32.mrb[66].mxu1 }
 0x1a5   : > { %v2119_v63 = vadd.f32 %v2081_v4, %v4812_v8  ;;  %v3459_v49 = vpop.f32.mrb[67].mxu1  ;;  %v2561_v8 = vmul.f32 %v2118_v56, %v2118_v56 }
 0x1a6   : > { %v2117_v35 = vadd.f32 %v2073_v39, %v4806_v52  ;;  %v3460_v11 = vadd.f32 %v3459_v49, %v3458_v51  ;;  %v2559_v58 = vmul.f32 %v2116_v57, %v2116_v57 }
 0x1a7   : > { %v3190_v10 = vpack.c.bf16 %v2119_v63, %v2118_v56  ;;  %v2562_v7 = vmul.f32 %v2119_v63, %v2119_v63 }
 0x1a8   : > { %v3185_v13 = vpack.c.bf16 %v2117_v35, %v2116_v57  ;;  %v2538_v60 = vadd.f32 %v2117_v35, %v2116_v57  ;;  %v2560_v47 = vmul.f32 %v2117_v35, %v2117_v35  ;;  %v3637_v2 = vpop.f32.mrb[68].mxu0 }
 0x1a9   : > { %3224 = vst [vmem:[%s4858_s10 + $0x8] sm:$0xff] %v3190_v10   ;;  %v2094_v53 = vadd.f32 %v3637_v2, %v3451_v55  ;;  %v2085_v19 = vpop.f32.mrb[69].mxu0 }
 0x1aa   : > { %3186 = vst [vmem:[%s4858_s10] sm:$0xff] %v3185_v13   ;;  %v2539_v61 = vadd.f32 %v2538_v60, %v2118_v56  ;;  %v2575_v17 = vadd.f32 %v2560_v47, %v2559_v58  ;;  %v2086_v52 = vadd.f32 %v3445_v5, %v2085_v19  ;;  %v3638_v18 = vpop.f32.mrb[70].mxu0  ;;  %v3461_v41 = vpop.f32.mrb[68].mxu1 }
 0x1ab   : > { %v2122_v25 = vadd.f32 %v2094_v53, %v4821_v34  ;;  %v2097_v20 = vadd.f32 %v3638_v18, %v3454_v9  ;;  %v2088_v21 = vpop.f32.mrb[71].mxu0  ;;  %v3462_v50 = vpop.f32.mrb[69].mxu1 }
 0x1ac   : > { %v2576_v30 = vadd.f32 %v2575_v17, %v2561_v8  ;;  %v2120_v31 = vadd.f32 %v2086_v52, %v4815_v14  ;;  %v2540_v32 = vadd.f32 %v2539_v61, %v2119_v63  ;;  %v2089_v62 = vadd.f32 %v3448_v26, %v2088_v21  ;;  %v3464_v12 = vpop.f32.mrb[70].mxu1 }
 0x1ad   : > { %v2123_v33 = vadd.f32 %v2097_v20, %v4824_v44  ;;  %v3463_v27 = vadd.f32 %v3462_v50, %v3461_v41  ;;  %v3465_v55 = vpop.f32.mrb[71].mxu1  ;;  %v2565_v44 = vmul.f32 %v2122_v25, %v2122_v25 }
 0x1ae   : > { %v2541_v42 = vadd.f32 %v2540_v32, %v2120_v31  ;;  %v2563_v5 = vmul.f32 %v2120_v31, %v2120_v31  ;;  %v2577_v22 = vadd.f32 %v2576_v30, %v2562_v7  ;;  %v2121_v34 = vadd.f32 %v2089_v62, %v4818_v28 }
 0x1af   : > { %v3200_v46 = vpack.c.bf16 %v2123_v33, %v2122_v25  ;;  %v3466_v23 = vadd.f32 %v3465_v55, %v3464_v12  ;;  %v2566_v40 = vmul.f32 %v2123_v33, %v2123_v33 }
 0x1b0   : > { %v2578_v9 = vadd.f32 %v2577_v22, %v2563_v5  ;;  %v3195_v16 = vpack.c.bf16 %v2121_v34, %v2120_v31  ;;  %v2542_v14 = vadd.f32 %v2541_v42, %v2121_v34  ;;  %v2564_v43 = vmul.f32 %v2121_v34, %v2121_v34  ;;  %v3641_v26 = vpop.f32.mrb[72].mxu0 }
 0x1b1   : > { %3226 = vst [vmem:[%s4858_s10 + $0x18] sm:$0xff] %v3200_v46   ;;  %v2110_v24 = vadd.f32 %v3641_v26, %v3463_v27  ;;  %v2101_v37 = vpop.f32.mrb[73].mxu0 }
 0x1b2   : > { %3225 = vst [vmem:[%s4858_s10 + $0x10] sm:$0xff] %v3195_v16   ;;  %v2543_v36 = vadd.f32 %v2542_v14, %v2122_v25  ;;  %v2579_v56 = vadd.f32 %v2578_v9, %v2564_v43  ;;  %v2102_v4 = vadd.f32 %v3457_v48, %v2101_v37  ;;  %v3642_v29 = vpop.f32.mrb[74].mxu0  ;;  %v3497_v1 = vpop.f32.mrb[72].mxu1 }
 0x1b3   : > { %v2126_v28 = vadd.f32 %v2110_v24, %v4833_v59  ;;  %v2113_v57 = vadd.f32 %v3642_v29, %v3466_v23  ;;  %v2104_v39 = vpop.f32.mrb[75].mxu0  ;;  %v3498_v10 = vpop.f32.mrb[73].mxu1 }
 0x1b4   : > { %v2580_v63 = vadd.f32 %v2579_v56, %v2565_v44  ;;  %v2124_v51 = vadd.f32 %v2102_v4, %v4827_v38  ;;  %v2544_v35 = vadd.f32 %v2543_v36, %v2123_v33  ;;  %v2105_v49 = vadd.f32 %v3460_v11, %v2104_v39  ;;  %v3500_v60 = vpop.f32.mrb[74].mxu1 }
 0x1b5   : > { %v2127_v58 = vadd.f32 %v2113_v57, %v4836_v54  ;;  %v3499_v13 = vadd.f32 %v3498_v10, %v3497_v1  ;;  %v3501_v53 = vpop.f32.mrb[75].mxu1  ;;  %v2569_v52 = vmul.f32 %v2126_v28, %v2126_v28 }
 0x1b6   : > { %v2545_v48 = vadd.f32 %v2544_v35, %v2124_v51  ;;  %v2567_v47 = vmul.f32 %v2124_v51, %v2124_v51  ;;  %v2581_v2 = vadd.f32 %v2580_v63, %v2566_v40  ;;  %v2125_v59 = vadd.f32 %v2105_v49, %v4830_v45 }
 0x1b7   : > { %v3210_v19 = vpack.c.bf16 %v2127_v58, %v2126_v28  ;;  %v3502_v8 = vadd.f32 %v3501_v53, %v3500_v60  ;;  %v2570_v25 = vmul.f32 %v2127_v58, %v2127_v58 }
 0x1b8   : > { %v2582_v61 = vadd.f32 %v2581_v2, %v2567_v47  ;;  %v3205_v17 = vpack.c.bf16 %v2125_v59, %v2124_v51  ;;  %v2546_v38 = vadd.f32 %v2545_v48, %v2125_v59  ;;  %v2568_v11 = vmul.f32 %v2125_v59, %v2125_v59 }
 0x1b9   : > { %3228 = vst [vmem:[%s4858_s10 + $0x28] sm:$0xff] %v3210_v19  }
 0x1ba   : > { %3227 = vst [vmem:[%s4858_s10 + $0x20] sm:$0xff] %v3205_v17   ;;  %v2547_v54 = vadd.f32 %v2546_v38, %v2126_v28  ;;  %v2583_v18 = vadd.f32 %v2582_v61, %v2568_v11  ;;  %v3503_v7 = vpop.f32.mrb[76].mxu1 }
 0x1bb   : > { %v3504_v21 = vpop.f32.mrb[77].mxu1 }
 0x1bc   : > { %v2584_v20 = vadd.f32 %v2583_v18, %v2569_v52  ;;  %v2548_v41 = vadd.f32 %v2547_v54, %v2127_v58  ;;  %v3505_v45 = vadd.f32 %v3504_v21, %v3503_v7  ;;  %v3506_v30 = vpop.f32.mrb[78].mxu1 }
 0x1bd   : > { %v3507_v31 = vpop.f32.mrb[79].mxu1 }
 0x1be   : > { %v2585_v32 = vadd.f32 %v2584_v20, %v2570_v25  ;;  %v3508_v62 = vadd.f32 %v3507_v31, %v3506_v30 }
 0x1c0   : > { %v3661_v50 = vpop.f32.mrb[76].mxu0 }
 0x1c1   : > { %v2428_v33 = vadd.f32 %v3661_v50, %v3505_v45  ;;  %v2419_v27 = vpop.f32.mrb[77].mxu0 }
 0x1c2   : > { %v2420_v12 = vadd.f32 %v3499_v13, %v2419_v27  ;;  %v3662_v42 = vpop.f32.mrb[78].mxu0 }
 0x1c3   : > { %v2436_v5 = vadd.f32 %v2428_v33, %v4845_v15  ;;  %v2431_v22 = vadd.f32 %v3662_v42, %v3508_v62  ;;  %v2422_v34 = vpop.f32.mrb[79].mxu0 }
 0x1c4   : > { %v2434_v55 = vadd.f32 %v2420_v12, %v4839_v6  ;;  %v2423_v46 = vadd.f32 %v3502_v8, %v2422_v34 }
 0x1c5   : > { %v2437_v23 = vadd.f32 %v2431_v22, %v4848_v0  ;;  %v2573_v24 = vmul.f32 %v2436_v5, %v2436_v5 }
 0x1c6   : > { %v2549_v9 = vadd.f32 %v2548_v41, %v2434_v55  ;;  %v2571_v16 = vmul.f32 %v2434_v55, %v2434_v55  ;;  %v2435_v14 = vadd.f32 %v2423_v46, %v4842_v3 }
 0x1c7   : > { %v3220_v43 = vpack.c.bf16 %v2437_v23, %v2436_v5 }
 0x1c8   : > { %v2586_v6 = vadd.f32 %v2585_v32, %v2571_v16  ;;  %v3215_v15 = vpack.c.bf16 %v2435_v14, %v2434_v55  ;;  %v2550_v26 = vadd.f32 %v2549_v9, %v2435_v14  ;;  %v2572_v0 = vmul.f32 %v2435_v14, %v2435_v14 }
 0x1c9   : > { %3230 = vst [vmem:[%s4858_s10 + $0x38] sm:$0xff] %v3220_v43  }
 0x1ca   : > { %3229 = vst [vmem:[%s4858_s10 + $0x30] sm:$0xff] %v3215_v15   ;;  %v2551_v3 = vadd.f32 %v2550_v26, %v2436_v5  ;;  %v2587_v37 = vadd.f32 %v2586_v6, %v2572_v0 }
 0x1cb   : > { %3909 = shalt.err (!%p3906_p9)
}
 0x1cc   : > { %s3910_s10 = scalar_lea.hbm %s4884_s6, 1024  ;;  %s3914_s30 = scalar_lea.hbm %s4977_s3, 4096 }
 0x1cd   : > { %p3911_p10 = scmp.ne.s32.totalorder %s4884_s6, %s3910_s10  ;;  %p3915_p13 = scmp.lt.u32.totalorder %s4884_s6, %s4977_s3 }
 0x1ce   : > { %p3916_p0 = scmp.lt.u32.totalorder %s3914_s30, %s3910_s10  ;;  %p3918_p2 = scmp.lt.u32.totalorder %s3910_s10, %s4884_s6 }
 0x1cf   : > { %p3912_p11 = pnand %p3911_p10, %p4106_p3 }
 0x1d0   : > { %p3917_p1 = por %p3916_p0, %p3915_p13 }
 0x1d1   : > { %p3913_p12 = pneg %p3912_p11 }
 0x1d2   : > { %p3919_p4 = por %p3918_p2, %p3917_p1 }
 0x1d4   : > { %p3920_p5 = pnand %p3919_p4, %p3913_p12 }
 0x1d6   : > { %3923 = shalt.err (!%p3920_p5)
}
 0x1d7   : > { %s4027_s12 = smov 64   ;;  %s4028_s13 = smov 4   ;;  %v2574_v44 = vmul.f32 %v2437_v23, %v2437_v23  ;;  %v2552_v36 = vadd.f32 %v2551_v3, %v2437_v23  ;;  %v2588_v56 = vadd.f32 %v2587_v37, %v2573_v24  ;;  %vm2596_vm3 = vcmask 1040384  }
 0x1d8   : > { %3666 = dma.vmem_to_hbm [thread:$0]  (%p4106_p3), %s4886_s11, 1024, %s4884_s6, %s2600_s14, %s4027_s12, %s4027_s12, %s4028_s13  }
 0x1d9   : > { %v2553_v4 = vrot.slane %v2552_v36, 4  ;;  %v2589_v29 = vadd.f32 %v2588_v56, %v2574_v44  ;;  %s2784_s26 = sshll.u32 %s4851_s27, 1  ;;  %s3154_s23 = sshll.u32 %s4010_s19, 1 }
 0x1da   : > { %s2635_s10 = sadd.s32 %s4006_s18, %s3154_s23  ;;  %s283_s6 = scalar_lea.vmem [#allocation5], %s2784_s26 }
 0x1db   : > { %v2554_v40 = vadd.f32 %v2553_v4, %v2552_v36  ;;  %v2590_v28 = vrot.slane %v2589_v29, 4  ;;  %s3155_s11 = sshll.u32 %s2635_s10, 5  ;;  %s2639_s14 = sshll.u32 %s283_s6, 4  ;;  %s4922_s14 = int_to_ptr.vmem [resolvable:$true] %s2639_s14 }
 0x1dc   : > { %s4920_s30 = scalar_lea.hbm %s4978_s4, %s3155_s11  ;;  %s2605_s18 = scalar_lea.sflag [#allocation6], %s4851_s27 }
 0x1dd   : > { %v2555_v57 = vrot.slane %v2554_v40, 2  ;;  %v2591_v39 = vadd.f32 %v2590_v28, %v2589_v29  ;;  %s3924_s19 = scalar_lea.vmem %s4922_s14, 32  ;;  %s4029_s8 = smov [#allocation5]  }
 0x1de   : > { %p3925_p6 = scmp.ne.s32.totalorder %s4922_s14, %s3924_s19  ;;  %s3928_s5 = sshll.u32 %s4029_s8, 4  ;;  %s3929_s5 = int_to_ptr.vmem [resolvable:$false] %s3928_s5 }
 0x1df   : > { %v2556_v1 = vadd.f32 %v2555_v57, %v2554_v40  ;;  %v2592_v63 = vrot.slane %v2591_v39, 2  ;;  %s3930_s12 = scalar_lea.vmem %s3929_s5, 64  ;;  %p3931_p10 = scmp.lt.s32.totalorder %s4922_s14, %s3929_s5 }
 0x1e0   : > { %p3926_p7 = pnand %p3925_p6, %p4106_p3  ;;  %p3932_p11 = scmp.lt.s32.totalorder %s3930_s12, %s3924_s19 }
 0x1e1   : > { %v2557_v51 = vrot.slane %v2556_v1, 1  ;;  %v2593_v35 = vadd.f32 %v2592_v63, %v2591_v39 }
 0x1e2   : > { %p3927_p9 = pneg %p3926_p7  ;;  %p3933_p12 = por %p3932_p11, %p3931_p10 }
 0x1e3   : > { %v2594_v49 = vrot.slane %v2593_v35, 1  ;;  %v2558_v10 = vadd.f32 %v2557_v51, %v2556_v1 }
 0x1e4   : > { %p3934_p13 = pnand %p3933_p12, %p3927_p9 }
 0x1e5   : > { %v2595_v58 = vadd.f32 %v2594_v49, %v2593_v35 }
 0x1e7   : > { %v2597_v13 = vsel %vm2596_vm3, %v2558_v10, %v2595_v58 }
 0x1e8   : > { %2598 = vst [vmem:[%s283_s6] sm:$0x3] %v2597_v13 }
 0x1e9   : > { %3937 = shalt.err (!%p3934_p13)
}
 0x1ea   : > { %s3938_s27 = scalar_lea.hbm %s4920_s30, 32  ;;  %s3942_s23 = scalar_lea.hbm %s4978_s4, 128 }
 0x1eb   : > { %p3939_p0 = scmp.ne.s32.totalorder %s4920_s30, %s3938_s27  ;;  %p3943_p4 = scmp.lt.u32.totalorder %s4920_s30, %s4978_s4 }
 0x1ec   : > { %p3944_p5 = scmp.lt.u32.totalorder %s3942_s23, %s3938_s27  ;;  %p3946_p7 = scmp.lt.u32.totalorder %s3938_s27, %s4920_s30 }
 0x1ed   : > { %p3940_p1 = pnand %p3939_p0, %p4106_p3 }
 0x1ee   : > { %p3945_p6 = por %p3944_p5, %p3943_p4 }
 0x1ef   : > { %p3941_p2 = pneg %p3940_p1 }
 0x1f0   : > { %p3947_p9 = por %p3946_p7, %p3945_p6 }
 0x1f2   : > { %p3948_p10 = pnand %p3947_p9, %p3941_p2 }
 0x1f4   : > { %3951 = shalt.err (!%p3948_p10)
}
 0x1f5   : > { %3667 = dma.vmem_to_hbm [thread:$0]  (%p4106_p3), %s4922_s14, 32, %s4920_s30, %s2605_s18  }
 0x1f6 PF: > { %p3677_p11 = scmp.ge.s32.totalorder %s4022_s22, 2  ;;  %s2651_s6 = sand.u32 1, %s3994_s15  }
 0x1f7   : > { %s2652_s9 = scalar_lea.sflag [#allocation4], %s2651_s6 }
 0x1f8   : > { %p3671_p12 = pnand %p3677_p11, %p4115_p8 }
 0x1fa   : > { %3985 = dma.done.wait (!%p3671_p12), %s2652_s9, 1024  }
 0x1fb   : > { %3987 = vsyncadd (!%p3671_p12), %s2652_s9, 4294966272  ;;  %s2661_s24 = scalar_lea.sflag [#allocation6], %s2651_s6 }
 0x1fc   : > { %3989 = dma.done.wait (!%p3671_p12), %s2661_s24, 32  }
 0x1fd   : > { %3991 = vsyncadd (!%p3671_p12), %s2661_s24, 4294967264  ;;  %s21_s22 = sadd.s32 1, %s4022_s22   ;;  %s4986_s28 = sld [smem:[#allocation9_spill]] }
 0x1fe   : > { %p18_p13 = scmp.ge.s32.totalorder %s21_s22, 6   ;;  %s4987_s15 = smov %s3998_s16 }
 0x1ff   : > { %s4988_s16 = smov %s4002_s17  ;;  %s4989_s17 = smov %s4124_s7 }
 0x200   : > { %s4990_s18 = smov %s4014_s20  ;;  %s4991_s19 = smov %s4018_s21 }
 0x201   : > { %s4992_s20 = smov %s4995_s25  ;;  %20 = sbr.rel (!%p18_p13) target bundleno = 7 (0x7), region = 89 }
 0x203   : > { %s4993_s21 = smov %s4986_s28 }
 0x208   :  { %2666 = vsyncpa [#allocation4], 1 }
 0x209   :  { %2668 = vsyncpa [#allocation4 + $0x1], 1 }
 0x20a   :  { %2669 = vsyncpa [#allocation6], 1 }
 0x20b   :  { %2671 = vsyncpa [#allocation6 + $0x1], 1 }

</bundles_post_ra>
